<compile_context>
chip_gen: v6e
topology: v6e:2x2x1
jax: 0.10.0
libtpu: 0.0.40
codegen_flags: <defaults>
</compile_context>

<pallas_src>
import jax
import jax.numpy as jnp
from jax.experimental import pallas as pl
from jax.experimental.pallas import tpu as pltpu


def _resident_spec(shape, index_map):
    """BlockSpec for constant-index operands (weights / bias).

    They stay resident in VMEM across the whole grid; when the installed
    Pallas supports per-BlockSpec pipeline_mode, request a single buffer so no
    useless second copy of the weight slab is allocated.
    """
    if hasattr(pl, "Buffered"):
        try:
            return pl.BlockSpec(shape, index_map, pipeline_mode=pl.Buffered(1))
        except TypeError:
            pass
    return pl.BlockSpec(shape, index_map)


def upsample_conv_kernel(xm_ref, xt_ref, xb_ref, w_ref, b_ref, o_ref):
    """Fused 2x nearest upsample + 3x3 'same' conv, phase decomposed.

    xm_ref: (1, tH, W, C)     main original-res rows [h0, h0+tH)
    xt_ref: (1, 1,  W, C)     halo row h0-1   (clamped; zeroed here when h==0)
    xb_ref: (1, 1,  W, C)     halo row h0+tH  (clamped; zeroed here when last)
    w_ref : (2, 2C, 4C)       per-row-phase weights, K=(row tap, cin),
                              N=(col phase b, col tap ss, cout)
    b_ref : (1, 2C)           bias tiled over the two column phases
    o_ref : (1, tH, 2, W, 2C) output viewed as (N, H, 2, W, 2C)
    """
    _, tH, W, C = xm_ref.shape
    h = pl.program_id(1)
    last = pl.num_programs(1) - 1
    f32 = jnp.float32

    # In-kernel image-border handling (no HBM pad): zero the halo rows at the
    # first / last row tile.
    top = jnp.where(h == 0, jnp.zeros_like(xt_ref[0]), xt_ref[0])
    bot = jnp.where(h == last, jnp.zeros_like(xb_ref[0]), xb_ref[0])
    xw = jnp.concatenate([top, xm_ref[0], bot], axis=0).astype(f32)  # (tH+2, W, C)

    bias2 = b_ref[...].astype(f32).reshape(1, 1, 2 * C)
    zcol = jnp.zeros((tH, 1, C), f32)

    for a in range(2):  # row phase of the 2x upsample (output row = 2*i + a)
        # K = 2C patch: the two nonzero row taps of phase a, columns UNSHIFTED.
        q = jnp.concatenate([xw[a:a + tH], xw[a + 1:a + 1 + tH]], axis=-1)  # (tH, W, 2C)
        # One MXU matmul per row phase; N = 4C packs both column phases and
        # their +-1 column-shift contributions (shifts commute with the
        # channel contraction, so they are applied AFTER the matmul).
        r = jnp.dot(q.reshape(tH * W, 2 * C), w_ref[a],
                    preferred_element_type=f32).reshape(tH, W, 4 * C)
        rm1 = r[:, :, :C]         # needs column shift -1   (column phase b=0)
        r0 = r[:, :, C:3 * C]     # unshifted, already ordered (b=0, b=1)
        rp1 = r[:, :, 3 * C:]     # needs column shift +1   (column phase b=1)
        corr = jnp.concatenate(
            [jnp.concatenate([zcol, rm1[:, :W - 1, :]], axis=1),  # shift right
             jnp.concatenate([rp1[:, 1:, :], zcol], axis=1)],     # shift left
            axis=-1)                                              # (tH, W, 2C)
        y = r0 + corr + bias2
        # Direct per-phase store: no row/col interleave temporaries.
        o_ref[0, :, a, :, :] = y.astype(o_ref.dtype)


def _phase_weights(w_oihw):
    """PyTorch OIHW 3x3 weights -> (2, 2C, 4C) row-phase slabs.

    Nearest-2x upsampling folds the 3x3 kernel into a 2x2 kernel per output
    phase (a, b): only 4 of the 9 taps are nonzero.  Layout:
        K axis: (row tap rr, cin)               -> 2C
        N axis: (col phase b, col tap ss, cout) -> 4C
    where col tap ss contributes at column shift delta = b + ss - 1.
    """
    C = w_oihw.shape[0]
    w_hwio = jnp.transpose(w_oihw, (2, 3, 1, 0)).astype(jnp.float32)  # (kh,kw,ci,co)
    # comb[p, t, k]: how kernel index k folds into the 2 nonzero taps t of phase p.
    comb = jnp.array([[[1., 0., 0.],
                       [0., 1., 1.]],
                      [[1., 1., 0.],
                       [0., 0., 1.]]], dtype=jnp.float32)             # (2, 2, 3)
    weff = jnp.einsum('arh,bsw,hwio->abrsio', comb, comb, w_hwio)     # (2,2,2,2,C,C)
    return jnp.transpose(weff, (0, 2, 4, 1, 3, 5)).reshape(2, 2 * C, 4 * C)


def _vmem_capacity_bytes():
    try:
        return int(pltpu.get_tpu_info().vmem_capacity_bytes)
    except Exception:
        return 64 * 1024 * 1024  # conservative: v7x-sized per-core VMEM


def _pick_h_tile(N, H, W, C, itemsize, vmem_cap):
    """Largest divisor of H whose per-tile working set fits the VMEM budget."""
    # f32 temporaries per original-res row: window + 2 patches + result + corr/y.
    per_row = (W * C + 2 * (W * 2 * C) + W * 4 * C + 2 * (W * 2 * C)) * 4
    # Double-buffered pipelined input / output blocks.
    per_row += (W * C + W * 4 * C) * itemsize * 2
    budget = min(32 * 1024 * 1024, vmem_cap // 4)  # ~16 MiB v7x, 32 MiB v5e/v6e
    max_rows = max(1, budget // max(per_row, 1))
    if N % 2 == 1 and H >= 2:
        # v7x megacore: keep >=2 row tiles when the batch axis alone cannot
        # feed both TensorCores.
        max_rows = min(max_rows, max(1, H // 2))
    tile = 1
    for d in range(1, H + 1):
        if H % d == 0 and d <= max_rows:
            tile = d
    return tile, per_row


def upsample_forward_nhwc(x, w_oihw, bias):
    """x: (N, H, W, C) NHWC -> (N, 2H, 2W, C) NHWC (primary kernel API)."""
    N, H, W, C = x.shape
    G = _phase_weights(w_oihw)                                        # (2, 2C, 4C)
    b2 = jnp.concatenate([bias, bias]).reshape(1, 2 * C).astype(jnp.float32)

    vmem_cap = _vmem_capacity_bytes()
    tH, per_row = _pick_h_tile(N, H, W, C, x.dtype.itemsize, vmem_cap)
    grid = (N, H // tH)

    est = tH * per_row + G.size * 4 + b2.size * 4
    vmem_limit = int(min(int(0.75 * vmem_cap), max(32 * 1024 * 1024, 2 * est)))

    in_specs = [
        # main tH original-res rows (input is NOT padded in HBM)
        pl.BlockSpec((1, tH, W, C), lambda n, h: (n, h, 0, 0)),
        # 1-row halos above / below, clamped at the image border (zeroed in-kernel)
        pl.BlockSpec((1, 1, W, C),
                     lambda n, h: (n, jnp.maximum(h * tH - 1, 0), 0, 0)),
        pl.BlockSpec((1, 1, W, C),
                     lambda n, h: (n, jnp.minimum(h * tH + tH, H - 1), 0, 0)),
        # resident weight / bias slabs (constant index map, single buffer)
        _resident_spec((2, 2 * C, 4 * C), lambda n, h: (0, 0, 0)),
        _resident_spec((1, 2 * C), lambda n, h: (0, 0)),
    ]
    # Output declared (N, H, 2, W, 2C): phases are stored directly and the
    # final reshape to (N, 2H, 2W, C) is a free row-major dim merge.
    out_specs = pl.BlockSpec((1, tH, 2, W, 2 * C), lambda n, h: (n, h, 0, 0, 0))

    out = pl.pallas_call(
        upsample_conv_kernel,
        out_shape=jax.ShapeDtypeStruct((N, H, 2, W, 2 * C), x.dtype),
        grid_spec=pltpu.PrefetchScalarGridSpec(
            num_scalar_prefetch=0,
            grid=grid,
            in_specs=in_specs,
            out_specs=out_specs,
        ),
        compiler_params=pltpu.CompilerParams(
            dimension_semantics=("parallel", "parallel"),
            vmem_limit_bytes=vmem_limit,
        ),
    )(x, x, x, G, b2)

    return out.reshape(N, 2 * H, 2 * W, C)


def upsample_forward(x_nchw, w_oihw, bias):
    """PyTorch-parity entry point: (N, C, H, W) -> (N, C, 2H, 2W)."""
    # TODO(synk): these two transposes are XLA glue; prefer the NHWC API above.
    x = jnp.transpose(x_nchw, (0, 2, 3, 1))
    y = upsample_forward_nhwc(x, w_oihw, bias)
    return jnp.transpose(y, (0, 3, 1, 2))


def _reference(x_nchw, w_oihw, bias):
    """Pure-JAX reference: F.interpolate(nearest, 2x) + Conv2d(3x3, pad=1)."""
    xu = jnp.repeat(jnp.repeat(x_nchw, 2, axis=2), 2, axis=3)
    out = jax.lax.conv_general_dilated(
        xu, w_oihw, window_strides=(1, 1), padding="SAME",
        dimension_numbers=("NCHW", "OIHW", "NCHW"))
    return out + bias[None, :, None, None]


if __name__ == "__main__":
    key = jax.random.PRNGKey(0)
    k_x, k_w, k_b = jax.random.split(key, 3)

    N, C, H, W = 2, 4, 16, 16
    x = jax.random.normal(k_x, (N, C, H, W), dtype=jnp.float32)

    # Deterministic init matching nn.Conv2d default (uniform +/- 1/sqrt(fan_in)).
    fan_in = C * 3 * 3
    bound = 1.0 / (fan_in ** 0.5)
    w = jax.random.uniform(k_w, (C, C, 3, 3), minval=-bound, maxval=bound,
                           dtype=jnp.float32)
    b = jax.random.uniform(k_b, (C,), minval=-bound, maxval=bound,
                           dtype=jnp.float32)

    fwd = jax.jit(upsample_forward)
    out = jax.block_until_ready(fwd(x, w, b))
    assert out.shape == (N, C, 2 * H, 2 * W)

    ref = _reference(x, w, b)
    assert jnp.allclose(out, ref, atol=1e-4, rtol=1e-4), \
        float(jnp.max(jnp.abs(out - ref)))

    print("KERNEL_OK")
</pallas_src>

<mosaic_0001>
module attributes {stable_mosaic.version = 11 : i64} {
  func.func @upsample_conv_kernel(%arg0: i32, %arg1: i32, %arg2: memref<1x16x16x4xf32, #tpu.memory_space<vmem>>, %arg3: memref<1x1x16x4xf32, #tpu.memory_space<vmem>>, %arg4: memref<1x1x16x4xf32, #tpu.memory_space<vmem>>, %arg5: memref<2x8x16xf32, #tpu.memory_space<vmem>>, %arg6: memref<1x8xf32, #tpu.memory_space<vmem>>, %arg7: memref<1x16x2x16x8xf32, #tpu.memory_space<vmem>>) attributes {dimension_semantics = [#tpu.dimension_semantics<parallel>, #tpu.dimension_semantics<parallel>], iteration_bounds = array<i64: 2, 1>, scalar_prefetch = 0 : i64, scratch_operands = 0 : i64, tpu.core_type = #tpu.core_type<tc>, window_params = [{transform_indices = @transform_0, window_bounds = array<i64: 1, 16, 16, 4>}, {transform_indices = @transform_1, window_bounds = array<i64: 1, 1, 16, 4>}, {transform_indices = @transform_2, window_bounds = array<i64: 1, 1, 16, 4>}, {pipeline_mode = #tpu.pipeline_mode<synchronous>, transform_indices = @transform_3, window_bounds = array<i64: 2, 8, 16>}, {pipeline_mode = #tpu.pipeline_mode<synchronous>, transform_indices = @transform_4, window_bounds = array<i64: 1, 8>}, {transform_indices = @transform_5, window_bounds = array<i64: 1, 16, 2, 16, 8>}]} {
    %c0_i32 = arith.constant 0 : i32
    %0 = arith.cmpi eq, %arg1, %c0_i32 : i32
    %cst = arith.constant 0.000000e+00 : f32
    %1 = vector.broadcast %cst : f32 to vector<1x16x4xf32>
    %c0 = arith.constant 0 : index
    %c0_0 = arith.constant 0 : index
    %c0_1 = arith.constant 0 : index
    %c0_2 = arith.constant 0 : index
    %2 = vector.load %arg3[%c0, %c0_0, %c0_1, %c0_2] : memref<1x1x16x4xf32, #tpu.memory_space<vmem>>, vector<1x1x16x4xf32>
    %3 = vector.shape_cast %2 : vector<1x1x16x4xf32> to vector<1x16x4xf32>
    %4 = arith.select %0, %1, %3 : vector<1x16x4xf32>
    %c0_i32_3 = arith.constant 0 : i32
    %5 = arith.cmpi eq, %arg1, %c0_i32_3 : i32
    %cst_4 = arith.constant 0.000000e+00 : f32
    %6 = vector.broadcast %cst_4 : f32 to vector<1x16x4xf32>
    %c0_5 = arith.constant 0 : index
    %c0_6 = arith.constant 0 : index
    %c0_7 = arith.constant 0 : index
    %c0_8 = arith.constant 0 : index
    %7 = vector.load %arg4[%c0_5, %c0_6, %c0_7, %c0_8] : memref<1x1x16x4xf32, #tpu.memory_space<vmem>>, vector<1x1x16x4xf32>
    %8 = vector.shape_cast %7 : vector<1x1x16x4xf32> to vector<1x16x4xf32>
    %9 = arith.select %5, %6, %8 : vector<1x16x4xf32>
    %c0_9 = arith.constant 0 : index
    %c0_10 = arith.constant 0 : index
    %c0_11 = arith.constant 0 : index
    %c0_12 = arith.constant 0 : index
    %10 = vector.load %arg2[%c0_9, %c0_10, %c0_11, %c0_12] : memref<1x16x16x4xf32, #tpu.memory_space<vmem>>, vector<1x16x16x4xf32>
    %11 = vector.shape_cast %10 : vector<1x16x16x4xf32> to vector<16x16x4xf32>
    %12 = tpu.concatenate %4, %11, %9 in 0 : vector<1x16x4xf32>, vector<16x16x4xf32>, vector<1x16x4xf32> -> vector<18x16x4xf32>
    %c0_13 = arith.constant 0 : index
    %c0_14 = arith.constant 0 : index
    %13 = vector.load %arg6[%c0_13, %c0_14] : memref<1x8xf32, #tpu.memory_space<vmem>>, vector<1x8xf32>
    %14 = vector.shape_cast %13 : vector<1x8xf32> to vector<1x1x8xf32>
    %cst_15 = arith.constant 0.000000e+00 : f32
    %15 = vector.broadcast %cst_15 : f32 to vector<16x1x4xf32>
    %16 = vector.extract_strided_slice %12 {offsets = [0, 0, 0], sizes = [16, 16, 4], strides = [1, 1, 1]} : vector<18x16x4xf32> to vector<16x16x4xf32>
    %17 = vector.extract_strided_slice %12 {offsets = [1, 0, 0], sizes = [16, 16, 4], strides = [1, 1, 1]} : vector<18x16x4xf32> to vector<16x16x4xf32>
    %18 = tpu.concatenate %16, %17 in 2 : vector<16x16x4xf32>, vector<16x16x4xf32> -> vector<16x16x8xf32>
    %19 = vector.shape_cast %18 : vector<16x16x8xf32> to vector<256x8xf32>
    %c0_16 = arith.constant 0 : index
    %c0_17 = arith.constant 0 : index
    %c0_18 = arith.constant 0 : index
    %20 = vector.load %arg5[%c0_16, %c0_17, %c0_18] : memref<2x8x16xf32, #tpu.memory_space<vmem>>, vector<1x8x16xf32>
    %21 = vector.shape_cast %20 : vector<1x8x16xf32> to vector<8x16xf32>
    %cst_19 = arith.constant dense<0.000000e+00> : vector<256x16xf32>
    %22 = tpu.matmul %19, %21, %cst_19 {dimension_numbers = #tpu.dot_dimension_numbers<[1], [0], [0], [1], [0, 0, 1, 1], [], []>} : vector<256x8xf32>, vector<8x16xf32>, vector<256x16xf32> -> vector<256x16xf32>
    %23 = vector.shape_cast %22 : vector<256x16xf32> to vector<16x16x16xf32>
    %24 = vector.extract_strided_slice %23 {offsets = [0, 0, 0], sizes = [16, 16, 4], strides = [1, 1, 1]} : vector<16x16x16xf32> to vector<16x16x4xf32>
    %25 = vector.extract_strided_slice %23 {offsets = [0, 0, 4], sizes = [16, 16, 8], strides = [1, 1, 1]} : vector<16x16x16xf32> to vector<16x16x8xf32>
    %26 = vector.extract_strided_slice %23 {offsets = [0, 0, 12], sizes = [16, 16, 4], strides = [1, 1, 1]} : vector<16x16x16xf32> to vector<16x16x4xf32>
    %27 = vector.extract_strided_slice %24 {offsets = [0, 0, 0], sizes = [16, 15, 4], strides = [1, 1, 1]} : vector<16x16x4xf32> to vector<16x15x4xf32>
    %28 = tpu.concatenate %15, %27 in 1 : vector<16x1x4xf32>, vector<16x15x4xf32> -> vector<16x16x4xf32>
    %29 = vector.extract_strided_slice %26 {offsets = [0, 1, 0], sizes = [16, 15, 4], strides = [1, 1, 1]} : vector<16x16x4xf32> to vector<16x15x4xf32>
    %30 = tpu.concatenate %29, %15 in 1 : vector<16x15x4xf32>, vector<16x1x4xf32> -> vector<16x16x4xf32>
    %31 = tpu.concatenate %28, %30 in 2 : vector<16x16x4xf32>, vector<16x16x4xf32> -> vector<16x16x8xf32>
    %32 = arith.addf %25, %31 : vector<16x16x8xf32>
    %33 = vector.broadcast %14 : vector<1x1x8xf32> to vector<16x16x8xf32>
    %34 = arith.addf %32, %33 : vector<16x16x8xf32>
    %c0_20 = arith.constant 0 : index
    %c0_21 = arith.constant 0 : index
    %c0_22 = arith.constant 0 : index
    %c0_23 = arith.constant 0 : index
    %c0_24 = arith.constant 0 : index
    %35 = vector.load %arg7[%c0_20, %c0_21, %c0_22, %c0_23, %c0_24] : memref<1x16x2x16x8xf32, #tpu.memory_space<vmem>>, vector<1x16x1x16x8xf32>
    %36 = vector.shape_cast %35 : vector<1x16x1x16x8xf32> to vector<16x16x8xf32>
    %37 = vector.shape_cast %34 : vector<16x16x8xf32> to vector<1x16x1x16x8xf32>
    tpu.vector_store %arg7[%c0_20, %c0_21, %c0_22, %c0_23, %c0_24], %37 {strides = array<i32>} : memref<1x16x2x16x8xf32, #tpu.memory_space<vmem>>, vector<1x16x1x16x8xf32>,
    %38 = vector.extract_strided_slice %12 {offsets = [1, 0, 0], sizes = [16, 16, 4], strides = [1, 1, 1]} : vector<18x16x4xf32> to vector<16x16x4xf32>
    %39 = vector.extract_strided_slice %12 {offsets = [2, 0, 0], sizes = [16, 16, 4], strides = [1, 1, 1]} : vector<18x16x4xf32> to vector<16x16x4xf32>
    %40 = tpu.concatenate %38, %39 in 2 : vector<16x16x4xf32>, vector<16x16x4xf32> -> vector<16x16x8xf32>
    %41 = vector.shape_cast %40 : vector<16x16x8xf32> to vector<256x8xf32>
    %c1 = arith.constant 1 : index
    %c0_25 = arith.constant 0 : index
    %c0_26 = arith.constant 0 : index
    %42 = vector.load %arg5[%c1, %c0_25, %c0_26] : memref<2x8x16xf32, #tpu.memory_space<vmem>>, vector<1x8x16xf32>
    %43 = vector.shape_cast %42 : vector<1x8x16xf32> to vector<8x16xf32>
    %cst_27 = arith.constant dense<0.000000e+00> : vector<256x16xf32>
    %44 = tpu.matmul %41, %43, %cst_27 {dimension_numbers = #tpu.dot_dimension_numbers<[1], [0], [0], [1], [0, 0, 1, 1], [], []>} : vector<256x8xf32>, vector<8x16xf32>, vector<256x16xf32> -> vector<256x16xf32>
    %45 = vector.shape_cast %44 : vector<256x16xf32> to vector<16x16x16xf32>
    %46 = vector.extract_strided_slice %45 {offsets = [0, 0, 0], sizes = [16, 16, 4], strides = [1, 1, 1]} : vector<16x16x16xf32> to vector<16x16x4xf32>
    %47 = vector.extract_strided_slice %45 {offsets = [0, 0, 4], sizes = [16, 16, 8], strides = [1, 1, 1]} : vector<16x16x16xf32> to vector<16x16x8xf32>
    %48 = vector.extract_strided_slice %45 {offsets = [0, 0, 12], sizes = [16, 16, 4], strides = [1, 1, 1]} : vector<16x16x16xf32> to vector<16x16x4xf32>
    %49 = vector.extract_strided_slice %46 {offsets = [0, 0, 0], sizes = [16, 15, 4], strides = [1, 1, 1]} : vector<16x16x4xf32> to vector<16x15x4xf32>
    %50 = tpu.concatenate %15, %49 in 1 : vector<16x1x4xf32>, vector<16x15x4xf32> -> vector<16x16x4xf32>
    %51 = vector.extract_strided_slice %48 {offsets = [0, 1, 0], sizes = [16, 15, 4], strides = [1, 1, 1]} : vector<16x16x4xf32> to vector<16x15x4xf32>
    %52 = tpu.concatenate %51, %15 in 1 : vector<16x15x4xf32>, vector<16x1x4xf32> -> vector<16x16x4xf32>
    %53 = tpu.concatenate %50, %52 in 2 : vector<16x16x4xf32>, vector<16x16x4xf32> -> vector<16x16x8xf32>
    %54 = arith.addf %47, %53 : vector<16x16x8xf32>
    %55 = vector.broadcast %14 : vector<1x1x8xf32> to vector<16x16x8xf32>
    %56 = arith.addf %54, %55 : vector<16x16x8xf32>
    %c0_28 = arith.constant 0 : index
    %c0_29 = arith.constant 0 : index
    %c1_30 = arith.constant 1 : index
    %c0_31 = arith.constant 0 : index
    %c0_32 = arith.constant 0 : index
    %57 = vector.load %arg7[%c0_28, %c0_29, %c1_30, %c0_31, %c0_32] : memref<1x16x2x16x8xf32, #tpu.memory_space<vmem>>, vector<1x16x1x16x8xf32>
    %58 = vector.shape_cast %57 : vector<1x16x1x16x8xf32> to vector<16x16x8xf32>
    %59 = vector.shape_cast %56 : vector<16x16x8xf32> to vector<1x16x1x16x8xf32>
    tpu.vector_store %arg7[%c0_28, %c0_29, %c1_30, %c0_31, %c0_32], %59 {strides = array<i32>} : memref<1x16x2x16x8xf32, #tpu.memory_space<vmem>>, vector<1x16x1x16x8xf32>,
    return
  }
  func.func @transform_0(%arg0: i32, %arg1: i32) -> (i32, i32, i32, i32) {
    %c0_i32 = arith.constant 0 : i32
    %c0_i32_0 = arith.constant 0 : i32
    %c0_i32_1 = arith.constant 0 : i32
    return %arg0, %arg1, %c0_i32, %c0_i32_0 : i32, i32, i32, i32
  }
  func.func @transform_1(%arg0: i32, %arg1: i32) -> (i32, i32, i32, i32) {
    %c16_i32 = arith.constant 16 : i32
    %0 = arith.muli %arg1, %c16_i32 : i32
    %c1_i32 = arith.constant 1 : i32
    %1 = arith.subi %0, %c1_i32 : i32
    %c0_i32 = arith.constant 0 : i32
    %2 = arith.maxsi %1, %c0_i32 : i32
    %c0_i32_0 = arith.constant 0 : i32
    %c0_i32_1 = arith.constant 0 : i32
    %c0_i32_2 = arith.constant 0 : i32
    return %arg0, %2, %c0_i32_0, %c0_i32_1 : i32, i32, i32, i32
  }
  func.func @transform_2(%arg0: i32, %arg1: i32) -> (i32, i32, i32, i32) {
    %c16_i32 = arith.constant 16 : i32
    %0 = arith.muli %arg1, %c16_i32 : i32
    %c16_i32_0 = arith.constant 16 : i32
    %1 = arith.addi %0, %c16_i32_0 : i32
    %c15_i32 = arith.constant 15 : i32
    %2 = arith.minsi %1, %c15_i32 : i32
    %c0_i32 = arith.constant 0 : i32
    %c0_i32_1 = arith.constant 0 : i32
    %c0_i32_2 = arith.constant 0 : i32
    return %arg0, %2, %c0_i32, %c0_i32_1 : i32, i32, i32, i32
  }
  func.func @transform_3(%arg0: i32, %arg1: i32) -> (i32, i32, i32) {
    %c0_i32 = arith.constant 0 : i32
    %c0_i32_0 = arith.constant 0 : i32
    %c0_i32_1 = arith.constant 0 : i32
    %c0_i32_2 = arith.constant 0 : i32
    return %c0_i32, %c0_i32_0, %c0_i32_1 : i32, i32, i32
  }
  func.func @transform_4(%arg0: i32, %arg1: i32) -> (i32, i32) {
    %c0_i32 = arith.constant 0 : i32
    %c0_i32_0 = arith.constant 0 : i32
    %c0_i32_1 = arith.constant 0 : i32
    return %c0_i32, %c0_i32_0 : i32, i32
  }
  func.func @transform_5(%arg0: i32, %arg1: i32) -> (i32, i32, i32, i32, i32) {
    %c0_i32 = arith.constant 0 : i32
    %c0_i32_0 = arith.constant 0 : i32
    %c0_i32_1 = arith.constant 0 : i32
    %c0_i32_2 = arith.constant 0 : i32
    return %arg0, %arg1, %c0_i32, %c0_i32_0, %c0_i32_1 : i32, i32, i32, i32, i32
  }
}

</mosaic_0001>

<bundles_post_ra>
// kernel: upsample_forward.1
= control target key start
LH: loop header
LB: loop body
LE: loop exit
PB: predicated region body
PF: predicated region fallthrough
CT: control target
= control target key end

     0   :  { %s3097_s18 = smov 0   ;;  %s3099_s19 = smov 0   ;;  %s4337_s0 = inlined_call_operand.vmem [shape: f32[2,16,16,4], index: 0, kind: input, shape index: {}, may-alias: {0,1,2}]   ;;  %s4338_s1 = inlined_call_operand.vmem [shape: f32[2,16,16,4], index: 1, kind: input, shape index: {}, may-alias: {0,1,2}]   ;;  %s4339_s2 = inlined_call_operand.vmem [shape: f32[2,16,16,4], index: 2, kind: input, shape index: {}, may-alias: {0,1,2}]   ;;  %s4340_s3 = inlined_call_operand.vmem [shape: f32[2,8,16], index: 3, kind: input, shape index: {}]   ;;  %s4341_s4 = inlined_call_operand.vmem [shape: f32[1,8], index: 4, kind: input, shape index: {}]   ;;  %s4342_s5 = inlined_call_operand.vmem [shape: f32[2,16,2,16,8], index: 5, kind: output, shape index: {}]  }
   0x1   :  { %s3101_s20 = smov 0  }
   0x2 LB: > { %s27_s1 = sadd.s32 1, %s3057_s19  ;;  %p2726_p0 = scmp.ge.s32.totalorder %s3061_s20, 1  ;;  %s3061_s20 = sphi %s3101_s20, %s15_s20   ;;  %s3057_s19 = sphi %s3099_s19, %s4454_s19   ;;  %s3053_s18 = sphi %s3097_s18, %s4453_s18  }
   0x3   : > { %p29_p1 = scmp.ge.s32.totalorder %s27_s1, 2  ;;  %p273_p2 = scmp.lt.s32.totalorder %s3061_s20, 3 }
   0x5   : > { %s4456_s1 = smov (%p29_p1, %s27_s1), 0  ;;  %p274_p3 = pnand %p2726_p0, %p273_p2 }
   0x7   : > { %277 = sbr.rel (%p274_p3) target bundleno = 831 (0x33f), region = 40 }
   0xc   : > { %p338_p4 = scmp.lt.s32.totalorder %s3053_s18, 1  ;;  %v599_v0 = vld [vmem:[%s4340_s3] sm:$0xff]  ;;  %v2768_v1 = vld [vmem:[%s4340_s3 + $0x8] sm:$0xff]  ;;  %s3063_s28 = smov 4   ;;  %v3064_v34 = vmov 0.0   ;;  %vm566_vm0 = vcmask 31744  }
   0xd   : > { %2906 = vmatprep.subr.mxu0 %v599_v0  ;;  %2956 = vmatprep.subr.mxu1 %v2768_v1  ;;  %vm600_vm1 = vcmask 64512   ;;  %vm1051_vm2 = vcmask 1046528   ;;  %s3065_s6 = smov 120   ;;  %vm954_vm3 = vcmask 1040384   ;;  %s3066_s7 = smov 124  }
   0xe   : > { %s4458_s18 = smov (!%p338_p4, %s3053_s18), 1  ;;  %2907 = vmatpush3.msra.mxu0 %v599_v0  ;;  %2957 = vmatpush3.msra.mxu1 %v2768_v1 }
   0xf   : > { %s2835_s24 = sshll.u32 %s4458_s18, 8  ;;  %s2839_s8 = sshll.u32 %s4458_s18, 9 }
  0x10   : > { %s3127_s27 = scalar_lea.vmem %s4337_s0, %s2835_s24  ;;  %s4179_s11 = scalar_lea.vmem %s4342_s5, %s2839_s8 }
  0x11   : > { %v3130_v2 = vld [vmem:[%s3127_s27] sm:$0xff]  ;;  %v3133_v3 = vld [vmem:[%s3127_s27 + $0x8] sm:$0xff]  ;;  %v3140_v4 = vld [vmem:[%s3127_s27 + $0x10] sm:$0xff] }
  0x12   : > { %470 = vrot.lane.b32.xlu0 %v3130_v2, %s3063_s28  ;;  %472 = vrot.lane.b32.xlu1 %v3133_v3, %s3063_s28  ;;  %v3143_v5 = vld [vmem:[%s3127_s27 + $0x18] sm:$0xff]  ;;  %v3150_v6 = vld [vmem:[%s3127_s27 + $0x20] sm:$0xff] }
  0x13   : > { %v3153_v7 = vld [vmem:[%s3127_s27 + $0x28] sm:$0xff]  ;;  %v3160_v8 = vld [vmem:[%s3127_s27 + $0x30] sm:$0xff]  ;;  %v3163_v9 = vld [vmem:[%s3127_s27 + $0x38] sm:$0xff] }
  0x14   : > { %v3170_v10 = vld [vmem:[%s3127_s27 + $0x40] sm:$0xff]  ;;  %v3173_v11 = vld [vmem:[%s3127_s27 + $0x48] sm:$0xff]  ;;  %v3180_v12 = vld [vmem:[%s3127_s27 + $0x50] sm:$0xff] }
  0x15   : > { %v3183_v13 = vld [vmem:[%s3127_s27 + $0x58] sm:$0xff]  ;;  %v3190_v14 = vld [vmem:[%s3127_s27 + $0x60] sm:$0xff]  ;;  %v3193_v15 = vld [vmem:[%s3127_s27 + $0x68] sm:$0xff] }
  0x16   : > { %474 = vrot.lane.b32.xlu0 %v3140_v4, %s3063_s28  ;;  %476 = vrot.lane.b32.xlu1 %v3143_v5, %s3063_s28  ;;  %v3200_v16 = vld [vmem:[%s3127_s27 + $0x70] sm:$0xff]  ;;  %v3203_v17 = vld [vmem:[%s3127_s27 + $0x78] sm:$0xff] }
  0x17   : > { %v3210_v18 = vld [vmem:[%s3127_s27 + $0x80] sm:$0xff]  ;;  %v3213_v19 = vld [vmem:[%s3127_s27 + $0x88] sm:$0xff]  ;;  %v3220_v20 = vld [vmem:[%s3127_s27 + $0x90] sm:$0xff] }
  0x18   : > { %v3223_v21 = vld [vmem:[%s3127_s27 + $0x98] sm:$0xff]  ;;  %v3230_v22 = vld [vmem:[%s3127_s27 + $0xa0] sm:$0xff]  ;;  %v3233_v23 = vld [vmem:[%s3127_s27 + $0xa8] sm:$0xff] }
  0x19   : > { %v3240_v24 = vld [vmem:[%s3127_s27 + $0xb0] sm:$0xff]  ;;  %v3243_v25 = vld [vmem:[%s3127_s27 + $0xb8] sm:$0xff]  ;;  %v3250_v26 = vld [vmem:[%s3127_s27 + $0xc0] sm:$0xff] }
  0x1a   : > { %478 = vrot.lane.b32.xlu0 %v3150_v6, %s3063_s28  ;;  %480 = vrot.lane.b32.xlu1 %v3153_v7, %s3063_s28  ;;  %v3253_v27 = vld [vmem:[%s3127_s27 + $0xc8] sm:$0xff]  ;;  %v3260_v28 = vld [vmem:[%s3127_s27 + $0xd0] sm:$0xff] }
  0x1b   : > { %v3263_v29 = vld [vmem:[%s3127_s27 + $0xd8] sm:$0xff]  ;;  %v3270_v30 = vld [vmem:[%s3127_s27 + $0xe0] sm:$0xff]  ;;  %v3273_v31 = vld [vmem:[%s3127_s27 + $0xe8] sm:$0xff] }
  0x1c   : > { %v3280_v32 = vld [vmem:[%s3127_s27 + $0xf0] sm:$0xff]  ;;  %v3283_v33 = vld [vmem:[%s3127_s27 + $0xf8] sm:$0xff] }
  0x1e   : > { %482 = vrot.lane.b32.xlu0 %v3160_v8, %s3063_s28  ;;  %484 = vrot.lane.b32.xlu1 %v3163_v9, %s3063_s28 }
  0x22   : > { %486 = vrot.lane.b32.xlu0 %v3170_v10, %s3063_s28  ;;  %488 = vrot.lane.b32.xlu1 %v3173_v11, %s3063_s28 }
  0x26   : > { %490 = vrot.lane.b32.xlu0 %v3180_v12, %s3063_s28  ;;  %492 = vrot.lane.b32.xlu1 %v3183_v13, %s3063_s28 }
  0x2a   : > { %494 = vrot.lane.b32.xlu0 %v3190_v14, %s3063_s28  ;;  %496 = vrot.lane.b32.xlu1 %v3193_v15, %s3063_s28 }
  0x2e   : > { %498 = vrot.lane.b32.xlu0 %v3200_v16, %s3063_s28  ;;  %500 = vrot.lane.b32.xlu1 %v3203_v17, %s3063_s28 }
  0x32   : > { %502 = vrot.lane.b32.xlu0 %v3210_v18, %s3063_s28  ;;  %504 = vrot.lane.b32.xlu1 %v3213_v19, %s3063_s28 }
  0x36   : > { %506 = vrot.lane.b32.xlu0 %v3220_v20, %s3063_s28  ;;  %508 = vrot.lane.b32.xlu1 %v3223_v21, %s3063_s28 }
  0x3a   : > { %510 = vrot.lane.b32.xlu0 %v3230_v22, %s3063_s28  ;;  %512 = vrot.lane.b32.xlu1 %v3233_v23, %s3063_s28 }
  0x3e   : > { %514 = vrot.lane.b32.xlu0 %v3240_v24, %s3063_s28  ;;  %516 = vrot.lane.b32.xlu1 %v3243_v25, %s3063_s28 }
  0x42   : > { %518 = vrot.lane.b32.xlu0 %v3250_v26, %s3063_s28  ;;  %520 = vrot.lane.b32.xlu1 %v3253_v27, %s3063_s28 }
  0x46   : > { %522 = vrot.lane.b32.xlu0 %v3260_v28, %s3063_s28  ;;  %524 = vrot.lane.b32.xlu1 %v3263_v29, %s3063_s28 }
  0x4a   : > { %526 = vrot.lane.b32.xlu0 %v3270_v30, %s3063_s28  ;;  %528 = vrot.lane.b32.xlu1 %v3273_v31, %s3063_s28 }
  0x4e   : > { %530 = vrot.lane.b32.xlu0 %v3280_v32, %s3063_s28  ;;  %532 = vrot.lane.b32.xlu1 %v3283_v33, %s3063_s28 }
  0x52   : > { %3035 = vrot.lane.b32.xlu0 %v3064_v34, %s3063_s28 }
  0x84   : > { %v471_v35 = vpop.permute.xlu0 %470  ;;  %v473_v36 = vpop.permute.xlu1 %472 }
  0x85   : > { %v568_v37 = vsel %vm566_vm0, 0.0, %v473_v36  ;;  %v567_v38 = vsel %vm566_vm0, 0.0, %v471_v35 }
  0x86   : > { %2908 = vmatprep.mubr.msk.f32.mxu0 %vm600_vm1, %v567_v38 }
  0x87   : > { %2909 = vmatmul.mubr.msk.f32.vlgmr.msra.gmra.mxu0 %vm600_vm1, %v568_v37 }
  0x88   : > { %v475_v39 = vpop.permute.xlu0 %474  ;;  %v477_v40 = vpop.permute.xlu1 %476 }
  0x89   : > { %v569_v41 = vsel %vm566_vm0, %v3130_v2, %v475_v39  ;;  %v570_v42 = vsel %vm566_vm0, %v3133_v3, %v477_v40 }
  0x8a   : > { %2911 = vmatprep.mubr.msk.f32.mxu0 %vm600_vm1, %v569_v41  ;;  %2958 = vmatprep.mubr.msk.f32.mxu1 %vm600_vm1, %v569_v41 }
  0x8b   : > { %2912 = vmatmul.mubr.msk.f32.gmra.mxu0 %vm600_vm1, %v570_v42  ;;  %2959 = vmatmul.mubr.msk.f32.vlgmr.msra.gmra.mxu1 %vm600_vm1, %v570_v42 }
  0x8c   : > { %v479_v43 = vpop.permute.xlu0 %478  ;;  %v481_v44 = vpop.permute.xlu1 %480 }
  0x8d   : > { %v571_v45 = vsel %vm566_vm0, %v3140_v4, %v479_v43  ;;  %v572_v46 = vsel %vm566_vm0, %v3143_v5, %v481_v44 }
  0x8e   : > { %2914 = vmatprep.mubr.msk.f32.mxu0 %vm600_vm1, %v571_v45  ;;  %2961 = vmatprep.mubr.msk.f32.mxu1 %vm600_vm1, %v571_v45 }
  0x8f   : > { %2915 = vmatmul.mubr.msk.f32.gmra.mxu0 %vm600_vm1, %v572_v46  ;;  %2962 = vmatmul.mubr.msk.f32.gmra.mxu1 %vm600_vm1, %v572_v46 }
  0x90   : > { %v483_v47 = vpop.permute.xlu0 %482  ;;  %v485_v48 = vpop.permute.xlu1 %484 }
  0x91   : > { %v573_v49 = vsel %vm566_vm0, %v3150_v6, %v483_v47  ;;  %v574_v50 = vsel %vm566_vm0, %v3153_v7, %v485_v48 }
  0x92   : > { %2917 = vmatprep.mubr.msk.f32.mxu0 %vm600_vm1, %v573_v49  ;;  %2964 = vmatprep.mubr.msk.f32.mxu1 %vm600_vm1, %v573_v49 }
  0x93   : > { %2918 = vmatmul.mubr.msk.f32.gmra.mxu0 %vm600_vm1, %v574_v50  ;;  %2965 = vmatmul.mubr.msk.f32.gmra.mxu1 %vm600_vm1, %v574_v50 }
  0x94   : > { %v487_v51 = vpop.permute.xlu0 %486  ;;  %v489_v52 = vpop.permute.xlu1 %488 }
  0x95   : > { %v575_v53 = vsel %vm566_vm0, %v3160_v8, %v487_v51  ;;  %v576_v54 = vsel %vm566_vm0, %v3163_v9, %v489_v52 }
  0x96   : > { %2920 = vmatprep.mubr.msk.f32.mxu0 %vm600_vm1, %v575_v53  ;;  %2967 = vmatprep.mubr.msk.f32.mxu1 %vm600_vm1, %v575_v53 }
  0x97   : > { %2921 = vmatmul.mubr.msk.f32.gmra.mxu0 %vm600_vm1, %v576_v54  ;;  %2968 = vmatmul.mubr.msk.f32.gmra.mxu1 %vm600_vm1, %v576_v54 }
  0x98   : > { %v491_v55 = vpop.permute.xlu0 %490  ;;  %v493_v56 = vpop.permute.xlu1 %492 }
  0x99   : > { %v577_v57 = vsel %vm566_vm0, %v3170_v10, %v491_v55  ;;  %v578_v58 = vsel %vm566_vm0, %v3173_v11, %v493_v56 }
  0x9a   : > { %2923 = vmatprep.mubr.msk.f32.mxu0 %vm600_vm1, %v577_v57  ;;  %2970 = vmatprep.mubr.msk.f32.mxu1 %vm600_vm1, %v577_v57 }
  0x9b   : > { %2924 = vmatmul.mubr.msk.f32.gmra.mxu0 %vm600_vm1, %v578_v58  ;;  %2971 = vmatmul.mubr.msk.f32.gmra.mxu1 %vm600_vm1, %v578_v58 }
  0x9c   : > { %v495_v59 = vpop.permute.xlu0 %494  ;;  %v497_v60 = vpop.permute.xlu1 %496 }
  0x9d   : > { %v579_v61 = vsel %vm566_vm0, %v3180_v12, %v495_v59  ;;  %v580_v62 = vsel %vm566_vm0, %v3183_v13, %v497_v60 }
  0x9e   : > { %2926 = vmatprep.mubr.msk.f32.mxu0 %vm600_vm1, %v579_v61  ;;  %2973 = vmatprep.mubr.msk.f32.mxu1 %vm600_vm1, %v579_v61 }
  0x9f   : > { %2927 = vmatmul.mubr.msk.f32.gmra.mxu0 %vm600_vm1, %v580_v62  ;;  %2974 = vmatmul.mubr.msk.f32.gmra.mxu1 %vm600_vm1, %v580_v62 }
  0xa0   : > { %v499_v63 = vpop.permute.xlu0 %498  ;;  %v501_v0 = vpop.permute.xlu1 %500 }
  0xa1   : > { %v581_v1 = vsel %vm566_vm0, %v3190_v14, %v499_v63  ;;  %v582_v2 = vsel %vm566_vm0, %v3193_v15, %v501_v0 }
  0xa2   : > { %2929 = vmatprep.mubr.msk.f32.mxu0 %vm600_vm1, %v581_v1  ;;  %2976 = vmatprep.mubr.msk.f32.mxu1 %vm600_vm1, %v581_v1 }
  0xa3   : > { %2930 = vmatmul.mubr.msk.f32.gmra.mxu0 %vm600_vm1, %v582_v2  ;;  %2977 = vmatmul.mubr.msk.f32.gmra.mxu1 %vm600_vm1, %v582_v2 }
  0xa4   : > { %v503_v3 = vpop.permute.xlu0 %502  ;;  %v505_v4 = vpop.permute.xlu1 %504 }
  0xa5   : > { %v583_v5 = vsel %vm566_vm0, %v3200_v16, %v503_v3  ;;  %v584_v6 = vsel %vm566_vm0, %v3203_v17, %v505_v4 }
  0xa6   : > { %2932 = vmatprep.mubr.msk.f32.mxu0 %vm600_vm1, %v583_v5  ;;  %2979 = vmatprep.mubr.msk.f32.mxu1 %vm600_vm1, %v583_v5 }
  0xa7   : > { %2933 = vmatmul.mubr.msk.f32.gmra.mxu0 %vm600_vm1, %v584_v6  ;;  %2980 = vmatmul.mubr.msk.f32.gmra.mxu1 %vm600_vm1, %v584_v6 }
  0xa8   : > { %v507_v7 = vpop.permute.xlu0 %506  ;;  %v509_v8 = vpop.permute.xlu1 %508 }
  0xa9   : > { %v585_v9 = vsel %vm566_vm0, %v3210_v18, %v507_v7  ;;  %v586_v10 = vsel %vm566_vm0, %v3213_v19, %v509_v8 }
  0xaa   : > { %2935 = vmatprep.mubr.msk.f32.mxu0 %vm600_vm1, %v585_v9  ;;  %2982 = vmatprep.mubr.msk.f32.mxu1 %vm600_vm1, %v585_v9 }
  0xab   : > { %2936 = vmatmul.mubr.msk.f32.gmra.mxu0 %vm600_vm1, %v586_v10  ;;  %2983 = vmatmul.mubr.msk.f32.gmra.mxu1 %vm600_vm1, %v586_v10 }
  0xac   : > { %v511_v11 = vpop.permute.xlu0 %510  ;;  %v513_v12 = vpop.permute.xlu1 %512 }
  0xad   : > { %v587_v13 = vsel %vm566_vm0, %v3220_v20, %v511_v11  ;;  %v588_v14 = vsel %vm566_vm0, %v3223_v21, %v513_v12 }
  0xae   : > { %2938 = vmatprep.mubr.msk.f32.mxu0 %vm600_vm1, %v587_v13  ;;  %2985 = vmatprep.mubr.msk.f32.mxu1 %vm600_vm1, %v587_v13 }
  0xaf   : > { %2939 = vmatmul.mubr.msk.f32.gmra.mxu0 %vm600_vm1, %v588_v14  ;;  %2986 = vmatmul.mubr.msk.f32.gmra.mxu1 %vm600_vm1, %v588_v14 }
  0xb0   : > { %v515_v15 = vpop.permute.xlu0 %514  ;;  %v517_v16 = vpop.permute.xlu1 %516 }
  0xb1   : > { %v589_v17 = vsel %vm566_vm0, %v3230_v22, %v515_v15  ;;  %v590_v18 = vsel %vm566_vm0, %v3233_v23, %v517_v16 }
  0xb2   : > { %2941 = vmatprep.mubr.msk.f32.mxu0 %vm600_vm1, %v589_v17  ;;  %2988 = vmatprep.mubr.msk.f32.mxu1 %vm600_vm1, %v589_v17 }
  0xb3   : > { %2942 = vmatmul.mubr.msk.f32.gmra.mxu0 %vm600_vm1, %v590_v18  ;;  %2989 = vmatmul.mubr.msk.f32.gmra.mxu1 %vm600_vm1, %v590_v18 }
  0xb4   : > { %v519_v19 = vpop.permute.xlu0 %518  ;;  %v521_v20 = vpop.permute.xlu1 %520 }
  0xb5   : > { %v591_v21 = vsel %vm566_vm0, %v3240_v24, %v519_v19  ;;  %v592_v34 = vsel %vm566_vm0, %v3243_v25, %v521_v20 }
  0xb6   : > { %2944 = vmatprep.mubr.msk.f32.mxu0 %vm600_vm1, %v591_v21  ;;  %2991 = vmatprep.mubr.msk.f32.mxu1 %vm600_vm1, %v591_v21 }
  0xb7   : > { %2945 = vmatmul.mubr.msk.f32.gmra.mxu0 %vm600_vm1, %v592_v34  ;;  %2992 = vmatmul.mubr.msk.f32.gmra.mxu1 %vm600_vm1, %v592_v34 }
  0xb8   : > { %v523_v22 = vpop.permute.xlu0 %522  ;;  %v525_v23 = vpop.permute.xlu1 %524 }
  0xb9   : > { %v593_v35 = vsel %vm566_vm0, %v3250_v26, %v523_v22  ;;  %v594_v36 = vsel %vm566_vm0, %v3253_v27, %v525_v23 }
  0xba   : > { %2947 = vmatprep.mubr.msk.f32.mxu0 %vm600_vm1, %v593_v35  ;;  %2994 = vmatprep.mubr.msk.f32.mxu1 %vm600_vm1, %v593_v35 }
  0xbb   : > { %2948 = vmatmul.mubr.msk.f32.gmra.mxu0 %vm600_vm1, %v594_v36  ;;  %2995 = vmatmul.mubr.msk.f32.gmra.mxu1 %vm600_vm1, %v594_v36 }
  0xbc   : > { %v527_v24 = vpop.permute.xlu0 %526  ;;  %v529_v25 = vpop.permute.xlu1 %528 }
  0xbd   : > { %v595_v37 = vsel %vm566_vm0, %v3260_v28, %v527_v24  ;;  %v596_v38 = vsel %vm566_vm0, %v3263_v29, %v529_v25 }
  0xbe   : > { %2950 = vmatprep.mubr.msk.f32.mxu0 %vm600_vm1, %v595_v37  ;;  %2997 = vmatprep.mubr.msk.f32.mxu1 %vm600_vm1, %v595_v37 }
  0xbf   : > { %2951 = vmatmul.mubr.msk.f32.gmra.mxu0 %vm600_vm1, %v596_v38  ;;  %2998 = vmatmul.mubr.msk.f32.gmra.mxu1 %vm600_vm1, %v596_v38 }
  0xc0   : > { %v531_v26 = vpop.permute.xlu0 %530  ;;  %v533_v27 = vpop.permute.xlu1 %532 }
  0xc1   : > { %v597_v39 = vsel %vm566_vm0, %v3270_v30, %v531_v26  ;;  %v598_v40 = vsel %vm566_vm0, %v3273_v31, %v533_v27  ;;  %v2767_v31 = vld [vmem:[%s4341_s4] ss:$0 sm:$0xff] }
  0xc2   : > { %2953 = vmatprep.mubr.msk.f32.mxu0 %vm600_vm1, %v597_v39  ;;  %3000 = vmatprep.mubr.msk.f32.mxu1 %vm600_vm1, %v597_v39 }
  0xc3   : > { %2954 = vmatmul.mubr.msk.f32.gmra.mxu0 %vm600_vm1, %v598_v40  ;;  %3001 = vmatmul.mubr.msk.f32.gmra.mxu1 %vm600_vm1, %v598_v40 }
  0xc4   : > { %v3036_v28 = vpop.permute.xlu0 %3035  ;;  %1441 = vrot.lane.b32.xlu1 %v2767_v31, %s3063_s28 }
  0xc5   : > { %v3038_v29 = vunpack.i.h.bf16 %v3036_v28  ;;  %v3037_v41 = vunpack.i.l.bf16 %v3036_v28 }
  0xc7   : > { %v1644_v42 = vsel %vm566_vm0, %v3280_v32, %v3037_v41  ;;  %v1645_v30 = vsel %vm566_vm0, %v3283_v33, %v3038_v29 }
  0xc8   : > { %3003 = vmatprep.mubr.msk.f32.mxu1 %vm600_vm1, %v1644_v42 }
  0xc9   : > { %3004 = vmatmul.mubr.msk.f32.gmra.mxu1 %vm600_vm1, %v1645_v30 }
 0x147   : > { %v3424_v43 = vpop.f32.mrf.mxu0 }
 0x148   : > { %v1053_v44 = vrot.slane %v3424_v43, 1 }
 0x149   : > { %v3427_v45 = vpop.f32.mrf.mxu0 }
 0x14a   : > { %4386 = vst [vmem:[#allocation2_spill] sm:$0xff] %v3427_v45  ;;  %v1116_v32 = vsel %vm1051_vm2, %v1053_v44, 0.0  ;;  %v1052_v50 = vrot.slane %v3427_v45, 1 }
 0x14b   : > { %1150 = vrot.lane.b32.xlu0 %v1116_v32, %s3065_s6  ;;  %v3431_v33 = vpop.f32.mrf.mxu1  ;;  %v3434_v47 = vpop.f32.mrf.mxu0 }
 0x14c   : > { %v2008_v46 = vrot.slane %v3431_v33, 1  ;;  %v1056_v53 = vrot.slane %v3434_v47, 1  ;;  %v1054_v57 = vsel %vm1051_vm2, %v1052_v50, %v1053_v44 }
 0x14d   : > { %v3436_v48 = vpop.f32.mrf.mxu1  ;;  %v3451_v58 = vpop.f32.mrf.mxu0 }
 0x14e   : > { %4387 = vst [vmem:[#allocation3_spill] sm:$0xff] %v3436_v48  ;;  %v2007_v49 = vrot.slane %v3436_v48, 1  ;;  %v2071_v51 = vsel %vm1051_vm2, %v2008_v46, 0.0  ;;  %v1117_v60 = vsel %vm1051_vm2, %v1056_v53, 0.0  ;;  %v1055_v63 = vrot.slane %v3451_v58, 1 }
 0x14f   : > { %v3441_v52 = vpop.f32.mrf.mxu1  ;;  %2105 = vrot.lane.b32.xlu1 %v2071_v51, %s3065_s6  ;;  %v3461_v0 = vpop.f32.mrf.mxu0 }
 0x150   : > { %v2009_v54 = vsel %vm1051_vm2, %v2007_v49, %v2008_v46  ;;  %v2011_v55 = vrot.slane %v3441_v52, 1  ;;  %v1059_v1 = vrot.slane %v3461_v0, 1  ;;  %v1057_v5 = vsel %vm1051_vm2, %v1055_v63, %v1056_v53 }
 0x151   : > { %2103 = vrot.lane.b32.xlu0 %v2009_v54, %s3065_s6  ;;  %v3448_v56 = vpop.f32.mrf.mxu1  ;;  %v3471_v6 = vpop.f32.mrf.mxu0 }
 0x152   : > { %v2010_v59 = vrot.slane %v3448_v56, 1  ;;  %v2072_v61 = vsel %vm1051_vm2, %v2011_v55, 0.0  ;;  %v1118_v8 = vsel %vm1051_vm2, %v1059_v1, 0.0  ;;  %v1058_v11 = vrot.slane %v3471_v6, 1 }
 0x153   : > { %1148 = vrot.lane.b32.xlu1 %v1054_v57, %s3065_s6  ;;  %v3458_v62 = vpop.f32.mrf.mxu1  ;;  %v3481_v12 = vpop.f32.mrf.mxu0 }
 0x154   : > { %v2012_v2 = vsel %vm1051_vm2, %v2010_v59, %v2011_v55  ;;  %v2014_v3 = vrot.slane %v3458_v62, 1  ;;  %v1062_v13 = vrot.slane %v3481_v12, 1  ;;  %v1060_v17 = vsel %vm1051_vm2, %v1058_v11, %v1059_v1 }
 0x155   : > { %1154 = vrot.lane.b32.xlu0 %v1117_v60, %s3065_s6  ;;  %v3468_v4 = vpop.f32.mrf.mxu1  ;;  %v3491_v18 = vpop.f32.mrf.mxu0 }
 0x156   : > { %v2013_v7 = vrot.slane %v3468_v4, 1  ;;  %v2073_v9 = vsel %vm1051_vm2, %v2014_v3, 0.0  ;;  %v1119_v20 = vsel %vm1051_vm2, %v1062_v13, 0.0  ;;  %v1061_v22 = vrot.slane %v3491_v18, 1 }
 0x157   : > { %2109 = vrot.lane.b32.xlu1 %v2072_v61, %s3065_s6  ;;  %v3478_v10 = vpop.f32.mrf.mxu1  ;;  %v3501_v23 = vpop.f32.mrf.mxu0 }
 0x158   : > { %v2015_v14 = vsel %vm1051_vm2, %v2013_v7, %v2014_v3  ;;  %v2017_v15 = vrot.slane %v3478_v10, 1  ;;  %v1065_v35 = vrot.slane %v3501_v23, 1  ;;  %v1063_v37 = vsel %vm1051_vm2, %v1061_v22, %v1062_v13 }
 0x159   : > { %2107 = vrot.lane.b32.xlu0 %v2012_v2, %s3065_s6  ;;  %v3488_v16 = vpop.f32.mrf.mxu1  ;;  %v3511_v38 = vpop.f32.mrf.mxu0 }
 0x15a   : > { %v2016_v19 = vrot.slane %v3488_v16, 1  ;;  %v2074_v21 = vsel %vm1051_vm2, %v2017_v15, 0.0  ;;  %v1120_v27 = vsel %vm1051_vm2, %v1065_v35, 0.0  ;;  %v1064_v28 = vrot.slane %v3511_v38, 1 }
 0x15b   : > { %1152 = vrot.lane.b32.xlu1 %v1057_v5, %s3065_s6  ;;  %v3498_v34 = vpop.f32.mrf.mxu1  ;;  %v3521_v29 = vpop.f32.mrf.mxu0 }
 0x15c   : > { %v2018_v36 = vsel %vm1051_vm2, %v2016_v19, %v2017_v15  ;;  %v2020_v24 = vrot.slane %v3498_v34, 1  ;;  %v1068_v41 = vrot.slane %v3521_v29, 1  ;;  %v1066_v44 = vsel %vm1051_vm2, %v1064_v28, %v1065_v35 }
 0x15d   : > { %1158 = vrot.lane.b32.xlu0 %v1118_v8, %s3065_s6  ;;  %v3508_v25 = vpop.f32.mrf.mxu1  ;;  %v3531_v32 = vpop.f32.mrf.mxu0 }
 0x15e   : > { %v2019_v26 = vrot.slane %v3508_v25, 1  ;;  %v2075_v39 = vsel %vm1051_vm2, %v2020_v24, 0.0  ;;  %v1121_v49 = vsel %vm1051_vm2, %v1068_v41, 0.0  ;;  %v1067_v53 = vrot.slane %v3531_v32, 1 }
 0x15f   : > { %2113 = vrot.lane.b32.xlu1 %v2073_v9, %s3065_s6  ;;  %v3518_v40 = vpop.f32.mrf.mxu1  ;;  %v3541_v54 = vpop.f32.mrf.mxu0 }
 0x160   : > { %v2021_v42 = vsel %vm1051_vm2, %v2019_v26, %v2020_v24  ;;  %v2023_v30 = vrot.slane %v3518_v40, 1  ;;  %v1071_v55 = vrot.slane %v3541_v54, 1  ;;  %v1069_v61 = vsel %vm1051_vm2, %v1067_v53, %v1068_v41 }
 0x161   : > { %2111 = vrot.lane.b32.xlu0 %v2015_v14, %s3065_s6  ;;  %v3528_v31 = vpop.f32.mrf.mxu1  ;;  %v3551_v63 = vpop.f32.mrf.mxu0 }
 0x162   : > { %v2022_v46 = vrot.slane %v3528_v31, 1  ;;  %v2076_v50 = vsel %vm1051_vm2, %v2023_v30, 0.0  ;;  %v1122_v2 = vsel %vm1051_vm2, %v1071_v55, 0.0  ;;  %v1070_v7 = vrot.slane %v3551_v63, 1 }
 0x163   : > { %1156 = vrot.lane.b32.xlu1 %v1060_v17, %s3065_s6  ;;  %v3538_v51 = vpop.f32.mrf.mxu1  ;;  %v3561_v8 = vpop.f32.mrf.mxu0 }
 0x164   : > { %v2024_v57 = vsel %vm1051_vm2, %v2022_v46, %v2023_v30  ;;  %v2026_v59 = vrot.slane %v3538_v51, 1  ;;  %v1074_v9 = vrot.slane %v3561_v8, 1  ;;  %v1072_v15 = vsel %vm1051_vm2, %v1070_v7, %v1071_v55 }
 0x165   : > { %1162 = vrot.lane.b32.xlu0 %v1119_v20, %s3065_s6  ;;  %v3548_v60 = vpop.f32.mrf.mxu1  ;;  %v3571_v17 = vpop.f32.mrf.mxu0 }
 0x166   : > { %v2025_v1 = vrot.slane %v3548_v60, 1  ;;  %v2077_v3 = vsel %vm1051_vm2, %v2026_v59, 0.0  ;;  %v1123_v20 = vsel %vm1051_vm2, %v1074_v9, 0.0  ;;  %v1073_v35 = vrot.slane %v3571_v17, 1 }
 0x167   : > { %2117 = vrot.lane.b32.xlu1 %v2074_v21, %s3065_s6  ;;  %v3558_v5 = vpop.f32.mrf.mxu1 }
 0x168   : > { %v2027_v11 = vsel %vm1051_vm2, %v2025_v1, %v2026_v59  ;;  %v2029_v13 = vrot.slane %v3558_v5, 1 }
 0x169   : > { %2115 = vrot.lane.b32.xlu0 %v2018_v36, %s3065_s6  ;;  %v3568_v14 = vpop.f32.mrf.mxu1  ;;  %v3581_v36 = vpop.f32.mrf.mxu0 }
 0x16a   : > { %v2028_v19 = vrot.slane %v3568_v14, 1  ;;  %v2078_v21 = vsel %vm1051_vm2, %v2029_v13, 0.0  ;;  %v1077_v24 = vrot.slane %v3581_v36, 1 }
 0x16b   : > { %1160 = vrot.lane.b32.xlu1 %v1063_v37, %s3065_s6  ;;  %v3578_v22 = vpop.f32.mrf.mxu1  ;;  %v3591_v28 = vpop.f32.mrf.mxu0 }
 0x16c   : > { %v2030_v37 = vsel %vm1051_vm2, %v2028_v19, %v2029_v13  ;;  %v2032_v26 = vrot.slane %v3578_v22, 1  ;;  %v1076_v46 = vrot.slane %v3591_v28, 1 }
 0x16d   : > { %1166 = vrot.lane.b32.xlu0 %v1120_v27, %s3065_s6  ;;  %v3588_v27 = vpop.f32.mrf.mxu1 }
 0x16e   : > { %v2031_v41 = vrot.slane %v3588_v27, 1  ;;  %v2079_v30 = vsel %vm1051_vm2, %v2032_v26, 0.0  ;;  %v1078_v59 = vsel %vm1051_vm2, %v1076_v46, %v1077_v24 }
 0x16f   : > { %2121 = vrot.lane.b32.xlu1 %v2075_v39, %s3065_s6  ;;  %v1075_v39 = vsel %vm1051_vm2, %v1073_v35, %v1074_v9 }
 0x170   : > { %v2033_v53 = vsel %vm1051_vm2, %v2031_v41, %v2032_v26 }
 0x171   : > { %2119 = vrot.lane.b32.xlu0 %v2021_v42, %s3065_s6  ;;  %v1124_v42 = vsel %vm1051_vm2, %v1077_v24, 0.0 }
 0x173   : > { %1164 = vrot.lane.b32.xlu1 %v1066_v44, %s3065_s6  ;;  %v3598_v44 = vpop.f32.mrf.mxu1 }
 0x174   : > { %v2035_v55 = vrot.slane %v3598_v44, 1 }
 0x175   : > { %1170 = vrot.lane.b32.xlu0 %v1121_v49, %s3065_s6  ;;  %v3601_v49 = vpop.f32.mrf.mxu0 }
 0x177   : > { %2125 = vrot.lane.b32.xlu1 %v2076_v50, %s3065_s6  ;;  %v1080_v50 = vrot.slane %v3601_v49, 1 }
 0x179   : > { %2123 = vrot.lane.b32.xlu0 %v2024_v57, %s3065_s6  ;;  %v3608_v57 = vpop.f32.mrf.mxu1 }
 0x17a   : > { %v2034_v1 = vrot.slane %v3608_v57, 1 }
 0x17b   : > { %1168 = vrot.lane.b32.xlu1 %v1069_v61, %s3065_s6  ;;  %v3611_v61 = vpop.f32.mrf.mxu0  ;;  %v3618_v7 = vpop.f32.mrf.mxu1 }
 0x17c   : > { %4388 = vst [vmem:[#allocation4_spill] sm:$0xff] %v3618_v7  ;;  %v1079_v9 = vrot.slane %v3611_v61, 1  ;;  %v2038_v19 = vrot.slane %v3618_v7, 1 }
 0x17d   : > { %1174 = vrot.lane.b32.xlu0 %v1122_v2, %s3065_s6  ;;  %v1125_v2 = vsel %vm1051_vm2, %v1080_v50, 0.0 }
 0x17e   : > { %v2081_v26 = vsel %vm1051_vm2, %v2038_v19, 0.0 }
 0x17f   : > { %2129 = vrot.lane.b32.xlu1 %v2077_v3, %s3065_s6  ;;  %v2080_v3 = vsel %vm1051_vm2, %v2035_v55, 0.0 }
 0x181   : > { %2127 = vrot.lane.b32.xlu0 %v2027_v11, %s3065_s6  ;;  %v3621_v11 = vpop.f32.mrf.mxu0 }
 0x182   : > { %v1083_v13 = vrot.slane %v3621_v11, 1 }
 0x183   : > { %1172 = vrot.lane.b32.xlu1 %v1072_v15, %s3065_s6  ;;  %v2036_v15 = vsel %vm1051_vm2, %v2034_v1, %v2035_v55  ;;  %v3631_v35 = vpop.f32.mrf.mxu0 }
 0x184   : > { %v1082_v41 = vrot.slane %v3631_v35, 1 }
 0x185   : > { %1178 = vrot.lane.b32.xlu0 %v1123_v20, %s3065_s6  ;;  %v3628_v20 = vpop.f32.mrf.mxu1 }
 0x186   : > { %v2037_v24 = vrot.slane %v3628_v20, 1  ;;  %v1084_v55 = vsel %vm1051_vm2, %v1082_v41, %v1083_v13 }
 0x187   : > { %2133 = vrot.lane.b32.xlu1 %v2078_v21, %s3065_s6  ;;  %v1081_v21 = vsel %vm1051_vm2, %v1079_v9, %v1080_v50 }
 0x188   : > { %v2039_v46 = vsel %vm1051_vm2, %v2037_v24, %v2038_v19 }
 0x189   : > { %2131 = vrot.lane.b32.xlu0 %v2030_v37, %s3065_s6  ;;  %v1126_v37 = vsel %vm1051_vm2, %v1083_v13, 0.0 }
 0x18b   : > { %1176 = vrot.lane.b32.xlu1 %v1075_v39, %s3065_s6  ;;  %v3638_v39 = vpop.f32.mrf.mxu1 }
 0x18c   : > { %4389 = vst [vmem:[#allocation5_spill] sm:$0xff] %v3638_v39  ;;  %v2041_v50 = vrot.slane %v3638_v39, 1 }
 0x18d   : > { %1182 = vrot.lane.b32.xlu0 %v1124_v42, %s3065_s6  ;;  %v3641_v42 = vpop.f32.mrf.mxu0 }
 0x18e   : > { %4390 = vst [vmem:[#allocation6_spill] sm:$0xff] %v3641_v42 }
 0x18f   : > { %2137 = vrot.lane.b32.xlu1 %v2079_v30, %s3065_s6  ;;  %v1086_v30 = vrot.slane %v3641_v42, 1 }
 0x191   : > { %2135 = vrot.lane.b32.xlu0 %v2033_v53, %s3065_s6  ;;  %v3648_v53 = vpop.f32.mrf.mxu1 }
 0x192   : > { %4391 = vst [vmem:[#allocation7_spill] sm:$0xff] %v3648_v53  ;;  %v2040_v1 = vrot.slane %v3648_v53, 1 }
 0x193   : > { %1180 = vrot.lane.b32.xlu1 %v1078_v59, %s3065_s6  ;;  %v3651_v59 = vpop.f32.mrf.mxu0  ;;  %v3658_v9 = vpop.f32.mrf.mxu1 }
 0x194   : > { %4392 = vst [vmem:[#allocation8_spill] sm:$0xff] %v3651_v59  ;;  %4393 = vst [vmem:[#allocation9_spill] sm:$0xff] %v3658_v9  ;;  %v2044_v24 = vrot.slane %v3658_v9, 1 }
 0x195   : > { %1186 = vrot.lane.b32.xlu0 %v1125_v2, %s3065_s6  ;;  %v1127_v2 = vsel %vm1051_vm2, %v1086_v30, 0.0  ;;  %v3661_v19 = vpop.f32.mrf.mxu0 }
 0x196   : > { %4394 = vst [vmem:[#allocation10_spill] sm:$0xff] %v3661_v19  ;;  %v1089_v13 = vrot.slane %v3661_v19, 1 }
 0x197   : > { %2141 = vrot.lane.b32.xlu1 %v2080_v3, %s3065_s6  ;;  %v2082_v3 = vsel %vm1051_vm2, %v2041_v50, 0.0  ;;  %v3671_v41 = vpop.f32.mrf.mxu0 }
 0x198   : > { %4396 = vst [vmem:[#allocation12_spill] sm:$0xff] %v3671_v41 }
 0x199   : > { %2139 = vrot.lane.b32.xlu0 %v2036_v15, %s3065_s6  ;;  %v1085_v15 = vrot.slane %v3651_v59, 1 }
 0x19b   : > { %1184 = vrot.lane.b32.xlu1 %v1081_v21, %s3065_s6  ;;  %v2042_v21 = vsel %vm1051_vm2, %v2040_v1, %v2041_v50  ;;  %v2083_v50 = vsel %vm1051_vm2, %v2044_v24, 0.0 }
 0x19d   : > { %1190 = vrot.lane.b32.xlu0 %v1126_v37, %s3065_s6  ;;  %v3668_v37 = vpop.f32.mrf.mxu1 }
 0x19e   : > { %4395 = vst [vmem:[#allocation11_spill] sm:$0xff] %v3668_v37 }
 0x19f   : > { %2145 = vrot.lane.b32.xlu1 %v2081_v26, %s3065_s6  ;;  %v1087_v26 = vsel %vm1051_vm2, %v1085_v15, %v1086_v30  ;;  %v3678_v1 = vpop.f32.mrf.mxu1 }
 0x1a0   : > { %4397 = vst [vmem:[#allocation13_spill] sm:$0xff] %v3678_v1 }
 0x1a1   : > { %2143 = vrot.lane.b32.xlu0 %v2039_v46, %s3065_s6  ;;  %v2043_v46 = vrot.slane %v3668_v37, 1 }
 0x1a3   : > { %1188 = vrot.lane.b32.xlu1 %v1084_v55, %s3065_s6  ;;  %v1128_v55 = vsel %vm1051_vm2, %v1089_v13, 0.0  ;;  %v2045_v15 = vsel %vm1051_vm2, %v2043_v46, %v2044_v24 }
 0x1a5   : > { %1194 = vrot.lane.b32.xlu0 %v1127_v2, %s3065_s6  ;;  %v1088_v2 = vrot.slane %v3671_v41, 1  ;;  %v3715_v41 = vpop.permute.xlu1 %1441 }
 0x1a6   : > { %4405 = vst [vmem:[#allocation21_spill] sm:$0xff] %v3715_v41 }
 0x1a7   : > { %2149 = vrot.lane.b32.xlu1 %v2082_v3, %s3065_s6  ;;  %v3681_v3 = vpop.f32.mrf.mxu0 }
 0x1a8   : > { %4398 = vst [vmem:[#allocation14_spill] sm:$0xff] %v3681_v3  ;;  %v1092_v30 = vrot.slane %v3681_v3, 1 }
 0x1a9   : > { %2147 = vrot.lane.b32.xlu0 %v2042_v21, %s3065_s6  ;;  %v2047_v21 = vrot.slane %v3678_v1, 1  ;;  %v3691_v37 = vpop.f32.mrf.mxu0 }
 0x1aa   : > { %4400 = vst [vmem:[#allocation16_spill] sm:$0xff] %v3691_v37  ;;  %v1129_v3 = vsel %vm1051_vm2, %v1092_v30, 0.0 }
 0x1ab   : > { %1192 = vrot.lane.b32.xlu1 %v1087_v26, %s3065_s6  ;;  %v3688_v26 = vpop.f32.mrf.mxu1  ;;  %v2084_v24 = vsel %vm1051_vm2, %v2047_v21, 0.0 }
 0x1ac   : > { %4399 = vst [vmem:[#allocation15_spill] sm:$0xff] %v3688_v26  ;;  %v2046_v9 = vrot.slane %v3688_v26, 1 }
 0x1ad   : > { %1198 = vrot.lane.b32.xlu0 %v1128_v55, %s3065_s6  ;;  %v1090_v55 = vsel %vm1051_vm2, %v1088_v2, %v1089_v13  ;;  %v3698_v46 = vpop.f32.mrf.mxu1 }
 0x1ae   : > { %4401 = vst [vmem:[#allocation17_spill] sm:$0xff] %v3698_v46  ;;  %v2048_v2 = vsel %vm1051_vm2, %v2046_v9, %v2047_v21 }
 0x1af   : > { %2153 = vrot.lane.b32.xlu1 %v2083_v50, %s3065_s6  ;;  %v1091_v50 = vrot.slane %v3691_v37, 1  ;;  %v3708_v26 = vpop.f32.mrf.mxu1 }
 0x1b0   : > { %4403 = vst [vmem:[#allocation19_spill] sm:$0xff] %v3708_v26  ;;  %v2049_v37 = vrot.slane %v3708_v26, 1 }
 0x1b1   : > { %2151 = vrot.lane.b32.xlu0 %v2045_v15, %s3065_s6  ;;  %v3701_v15 = vpop.f32.mrf.mxu0  ;;  %v3720_v21 = vpop.f32.mrf.mxu1 }
 0x1b2   : > { %4402 = vst [vmem:[#allocation18_spill] sm:$0xff] %v3701_v15  ;;  %v1095_v13 = vrot.slane %v3701_v15, 1  ;;  %4406 = vst [vmem:[#allocation22_spill] sm:$0xff] %v3720_v21  ;;  %v2053_v41 = vrot.slane %v3720_v21, 1 }
 0x1b3   : > { %1196 = vrot.lane.b32.xlu1 %v1090_v55, %s3065_s6  ;;  %v2050_v55 = vrot.slane %v3698_v46, 1  ;;  %v3711_v1 = vpop.f32.mrf.mxu0 }
 0x1b4   : > { %4404 = vst [vmem:[#allocation20_spill] sm:$0xff] %v3711_v1 }
 0x1b5   : > { %1202 = vrot.lane.b32.xlu0 %v1129_v3, %s3065_s6  ;;  %v1093_v3 = vsel %vm1051_vm2, %v1091_v50, %v1092_v30  ;;  %v2085_v9 = vsel %vm1051_vm2, %v2050_v55, 0.0  ;;  %v3723_v46 = vpop.f32.mrf.mxu0 }
 0x1b6   : > { %4407 = vst [vmem:[#allocation23_spill] sm:$0xff] %v3723_v46  ;;  %v1098_v50 = vrot.slane %v3723_v46, 1 }
 0x1b7   : > { %2157 = vrot.lane.b32.xlu1 %v2084_v24, %s3065_s6  ;;  %v1130_v24 = vsel %vm1051_vm2, %v1095_v13, 0.0 }
 0x1b9   : > { %2155 = vrot.lane.b32.xlu0 %v2048_v2, %s3065_s6  ;;  %v1094_v2 = vrot.slane %v3711_v1, 1  ;;  %v3733_v1 = vpop.f32.mrf.mxu0 }
 0x1ba   : > { %4409 = vst [vmem:[#allocation25_spill] sm:$0xff] %v3733_v1  ;;  %v1097_v21 = vrot.slane %v3733_v1, 1  ;;  %v1912_v1 = vrot.slane %v3431_v33, 7 }
 0x1bb   : > { %1200 = vrot.lane.b32.xlu1 %v1093_v3, %s3065_s6  ;;  %v2051_v3 = vsel %vm1051_vm2, %v2049_v37, %v2050_v55  ;;  %v1096_v15 = vsel %vm1051_vm2, %v1094_v2, %v1095_v13  ;;  %v2086_v37 = vsel %vm1051_vm2, %v2053_v41, 0.0  ;;  %v956_v2 = vrot.slane %v3424_v43, 7 }
 0x1bd   : > { %1206 = vrot.lane.b32.xlu0 %v1130_v24, %s3065_s6  ;;  %v1151_v30 = vpop.permute.xlu0 %1150  ;;  %v3730_v24 = vpop.f32.mrf.mxu1 }
 0x1be   : > { %4408 = vst [vmem:[#allocation24_spill] sm:$0xff] %v3730_v24  ;;  %v2052_v53 = vrot.slane %v3730_v24, 1 }
 0x1bf   : > { %2161 = vrot.lane.b32.xlu1 %v2085_v9, %s3065_s6  ;;  %v1131_v9 = vsel %vm1051_vm2, %v1098_v50, 0.0 }
 0x1c0   : > { %v2054_v13 = vsel %vm1051_vm2, %v2052_v53, %v2053_v41 }
 0x1c1   : > { %2159 = vrot.lane.b32.xlu0 %v2051_v3, %s3065_s6  ;;  %v2106_v26 = vpop.permute.xlu1 %2105  ;;  %v955_v3 = vrot.slane %v3427_v45, 7  ;;  %v1099_v45 = vsel %vm1051_vm2, %v1097_v21, %v1098_v50 }
 0x1c3   : > { %v2104_v19 = vpop.permute.xlu0 %2103  ;;  %1204 = vrot.lane.b32.xlu1 %v1096_v15, %s3065_s6  ;;  %v1911_v15 = vrot.slane %v3436_v48, 7  ;;  %v957_v24 = vsel %vm954_vm3, %v955_v3, %v956_v2 }
 0x1c4   : > { %v1245_v59 = vsel %vm566_vm0, %v957_v24, %v1151_v30  ;;  %v959_v30 = vrot.slane %v3434_v47, 7 }
 0x1c5   : > { %1210 = vrot.lane.b32.xlu0 %v1131_v9, %s3065_s6  ;;  %v1149_v55 = vpop.permute.xlu1 %1148  ;;  %v1913_v53 = vsel %vm954_vm3, %v1911_v15, %v1912_v1  ;;  %v1991_v2 = vsel %vm954_vm3, 0.0, %v1911_v15  ;;  %v1035_v1 = vsel %vm954_vm3, 0.0, %v955_v3 }
 0x1c6   : > { %v2199_v21 = vsel %vm566_vm0, %v1991_v2, %v2104_v19  ;;  %v962_v2 = vrot.slane %v3461_v0, 7 }
 0x1c7   : > { %v1155_v46 = vpop.permute.xlu0 %1154  ;;  %2165 = vrot.lane.b32.xlu1 %v2086_v37, %s3065_s6  ;;  %v958_v37 = vrot.slane %v3451_v58, 7 }
 0x1c9   : > { %2163 = vrot.lane.b32.xlu0 %v2054_v13, %s3065_s6  ;;  %v2110_v9 = vpop.permute.xlu1 %2109  ;;  %v2200_v13 = vsel %vm566_vm0, %v1913_v53, %v2106_v26  ;;  %v1244_v26 = vsel %vm566_vm0, %v1035_v1, %v1149_v55  ;;  %v960_v24 = vsel %vm954_vm3, %v958_v37, %v959_v30 }
 0x1ca   : > { %v1247_v19 = vsel %vm566_vm0, %v960_v24, %v1155_v46  ;;  %v1918_v46 = vrot.slane %v3458_v62, 7 }
 0x1cb   : > { %v2108_v39 = vpop.permute.xlu0 %2107  ;;  %1208 = vrot.lane.b32.xlu1 %v1099_v45, %s3065_s6  ;;  %v1915_v45 = vrot.slane %v3441_v52, 7 }
 0x1cd   : > { %1310 = vrot.lane.b32.xlu0 %v1245_v59, %s3063_s28  ;;  %v1153_v41 = vpop.permute.xlu1 %1152  ;;  %v1914_v59 = vrot.slane %v3448_v56, 7 }
 0x1cf   : > { %v1159_v48 = vpop.permute.xlu0 %1158  ;;  %2265 = vrot.lane.b32.xlu1 %v2200_v13, %s3063_s28  ;;  %v1916_v53 = vsel %vm954_vm3, %v1914_v59, %v1915_v45  ;;  %v1992_v55 = vsel %vm954_vm3, 0.0, %v1914_v59  ;;  %v1917_v45 = vrot.slane %v3468_v4, 7 }
 0x1d0   : > { %v2202_v3 = vsel %vm566_vm0, %v1916_v53, %v2110_v9  ;;  %v2201_v30 = vsel %vm566_vm0, %v1992_v55, %v2108_v39  ;;  %v965_v55 = vrot.slane %v3481_v12, 7 }
 0x1d1   : > { %2263 = vrot.lane.b32.xlu0 %v2199_v21, %s3063_s28  ;;  %v2114_v50 = vpop.permute.xlu1 %2113  ;;  %v961_v21 = vrot.slane %v3471_v6, 7  ;;  %v1919_v39 = vsel %vm954_vm3, %v1917_v45, %v1918_v46  ;;  %v1920_v46 = vrot.slane %v3488_v16, 7 }
 0x1d3   : > { %v2112_v15 = vpop.permute.xlu0 %2111  ;;  %1308 = vrot.lane.b32.xlu1 %v1244_v26, %s3063_s28  ;;  %v1036_v26 = vsel %vm954_vm3, 0.0, %v958_v37  ;;  %v963_v9 = vsel %vm954_vm3, %v961_v21, %v962_v2  ;;  %v2204_v37 = vsel %vm566_vm0, %v1919_v39, %v2114_v50 }
 0x1d4   : > { %v1249_v59 = vsel %vm566_vm0, %v963_v9, %v1159_v48  ;;  %v1921_v48 = vrot.slane %v3478_v10, 7 }
 0x1d5   : > { %1314 = vrot.lane.b32.xlu0 %v1247_v19, %s3063_s28  ;;  %v1157_v13 = vpop.permute.xlu1 %1156  ;;  %v1246_v19 = vsel %vm566_vm0, %v1036_v26, %v1153_v41  ;;  %v1993_v41 = vsel %vm954_vm3, 0.0, %v1917_v45 }
 0x1d6   : > { %v2203_v2 = vsel %vm566_vm0, %v1993_v41, %v2112_v15  ;;  %v1922_v15 = vsel %vm954_vm3, %v1920_v46, %v1921_v48  ;;  %v968_v41 = vrot.slane %v3501_v23, 7  ;;  %v1923_v48 = vrot.slane %v3508_v25, 7 }
 0x1d7   : > { %v1163_v1 = vpop.permute.xlu0 %1162  ;;  %2269 = vrot.lane.b32.xlu1 %v2202_v3, %s3063_s28 }
 0x1d9   : > { %2267 = vrot.lane.b32.xlu0 %v2201_v30, %s3063_s28  ;;  %v2118_v24 = vpop.permute.xlu1 %2117  ;;  %v964_v30 = vrot.slane %v3491_v18, 7 }
 0x1db   : > { %v2116_v53 = vpop.permute.xlu0 %2115  ;;  %1312 = vrot.lane.b32.xlu1 %v1246_v19, %s3063_s28  ;;  %v1037_v19 = vsel %vm954_vm3, 0.0, %v961_v21  ;;  %v966_v50 = vsel %vm954_vm3, %v964_v30, %v965_v55  ;;  %v2206_v21 = vsel %vm566_vm0, %v1922_v15, %v2118_v24 }
 0x1dc   : > { %v1251_v45 = vsel %vm566_vm0, %v966_v50, %v1163_v1  ;;  %v1924_v1 = vrot.slane %v3498_v34, 7 }
 0x1dd   : > { %1318 = vrot.lane.b32.xlu0 %v1249_v59, %s3063_s28  ;;  %v1161_v3 = vpop.permute.xlu1 %1160  ;;  %v1248_v59 = vsel %vm566_vm0, %v1037_v19, %v1157_v13  ;;  %v1994_v13 = vsel %vm954_vm3, 0.0, %v1920_v46 }
 0x1de   : > { %v2205_v55 = vsel %vm566_vm0, %v1994_v13, %v2116_v53  ;;  %v1925_v53 = vsel %vm954_vm3, %v1923_v48, %v1924_v1  ;;  %v971_v13 = vrot.slane %v3521_v29, 7  ;;  %v1926_v1 = vrot.slane %v3528_v31, 7 }
 0x1df   : > { %v1167_v26 = vpop.permute.xlu0 %1166  ;;  %2273 = vrot.lane.b32.xlu1 %v2204_v37, %s3063_s28 }
 0x1e1   : > { %2271 = vrot.lane.b32.xlu0 %v2203_v2, %s3063_s28  ;;  %v2122_v9 = vpop.permute.xlu1 %2121  ;;  %v967_v2 = vrot.slane %v3511_v38, 7 }
 0x1e3   : > { %v2120_v39 = vpop.permute.xlu0 %2119  ;;  %1316 = vrot.lane.b32.xlu1 %v1248_v59, %s3063_s28  ;;  %v1038_v59 = vsel %vm954_vm3, 0.0, %v964_v30  ;;  %v969_v24 = vsel %vm954_vm3, %v967_v2, %v968_v41  ;;  %v2208_v30 = vsel %vm566_vm0, %v1925_v53, %v2122_v9 }
 0x1e4   : > { %v1253_v46 = vsel %vm566_vm0, %v969_v24, %v1167_v26  ;;  %v1927_v26 = vrot.slane %v3518_v40, 7 }
 0x1e5   : > { %1322 = vrot.lane.b32.xlu0 %v1251_v45, %s3063_s28  ;;  %v1165_v37 = vpop.permute.xlu1 %1164  ;;  %v1250_v45 = vsel %vm566_vm0, %v1038_v59, %v1161_v3  ;;  %v1995_v3 = vsel %vm954_vm3, 0.0, %v1923_v48 }
 0x1e6   : > { %v2207_v41 = vsel %vm566_vm0, %v1995_v3, %v2120_v39  ;;  %v1928_v39 = vsel %vm954_vm3, %v1926_v1, %v1927_v26  ;;  %v974_v3 = vrot.slane %v3541_v54, 7  ;;  %v1929_v26 = vrot.slane %v3548_v60, 7 }
 0x1e7   : > { %v1171_v19 = vpop.permute.xlu0 %1170  ;;  %2277 = vrot.lane.b32.xlu1 %v2206_v21, %s3063_s28 }
 0x1e9   : > { %2275 = vrot.lane.b32.xlu0 %v2205_v55, %s3063_s28  ;;  %v2126_v50 = vpop.permute.xlu1 %2125  ;;  %v970_v55 = vrot.slane %v3531_v32, 7 }
 0x1eb   : > { %v2124_v15 = vpop.permute.xlu0 %2123  ;;  %1320 = vrot.lane.b32.xlu1 %v1250_v45, %s3063_s28  ;;  %v1039_v45 = vsel %vm954_vm3, 0.0, %v967_v2  ;;  %v972_v9 = vsel %vm954_vm3, %v970_v55, %v971_v13  ;;  %v2210_v2 = vsel %vm566_vm0, %v1928_v39, %v2126_v50 }
 0x1ec   : > { %v1255_v48 = vsel %vm566_vm0, %v972_v9, %v1171_v19  ;;  %v1930_v19 = vrot.slane %v3538_v51, 7 }
 0x1ed   : > { %1326 = vrot.lane.b32.xlu0 %v1253_v46, %s3063_s28  ;;  %v1169_v21 = vpop.permute.xlu1 %1168  ;;  %v1252_v46 = vsel %vm566_vm0, %v1039_v45, %v1165_v37  ;;  %v1996_v37 = vsel %vm954_vm3, 0.0, %v1926_v1 }
 0x1ee   : > { %v2209_v13 = vsel %vm566_vm0, %v1996_v37, %v2124_v15  ;;  %v1931_v15 = vsel %vm954_vm3, %v1929_v26, %v1930_v19  ;;  %v977_v37 = vrot.slane %v3561_v8, 7  ;;  %v1932_v19 = vrot.slane %v3568_v14, 7 }
 0x1ef   : > { %v1175_v59 = vpop.permute.xlu0 %1174  ;;  %2281 = vrot.lane.b32.xlu1 %v2208_v30, %s3063_s28 }
 0x1f1   : > { %2279 = vrot.lane.b32.xlu0 %v2207_v41, %s3063_s28  ;;  %v2130_v24 = vpop.permute.xlu1 %2129  ;;  %v973_v41 = vrot.slane %v3551_v63, 7 }
 0x1f3   : > { %v2128_v53 = vpop.permute.xlu0 %2127  ;;  %1324 = vrot.lane.b32.xlu1 %v1252_v46, %s3063_s28  ;;  %v1040_v46 = vsel %vm954_vm3, 0.0, %v970_v55  ;;  %v975_v50 = vsel %vm954_vm3, %v973_v41, %v974_v3  ;;  %v2212_v55 = vsel %vm566_vm0, %v1931_v15, %v2130_v24 }
 0x1f4   : > { %v1257_v1 = vsel %vm566_vm0, %v975_v50, %v1175_v59  ;;  %v1933_v59 = vrot.slane %v3558_v5, 7 }
 0x1f5   : > { %1330 = vrot.lane.b32.xlu0 %v1255_v48, %s3063_s28  ;;  %v1173_v30 = vpop.permute.xlu1 %1172  ;;  %v1254_v48 = vsel %vm566_vm0, %v1040_v46, %v1169_v21  ;;  %v1997_v21 = vsel %vm954_vm3, 0.0, %v1929_v26 }
 0x1f6   : > { %v2211_v3 = vsel %vm566_vm0, %v1997_v21, %v2128_v53  ;;  %v1934_v53 = vsel %vm954_vm3, %v1932_v19, %v1933_v59  ;;  %v980_v21 = vrot.slane %v3581_v36, 7  ;;  %v1935_v59 = vrot.slane %v3588_v27, 7 }
 0x1f7   : > { %v1179_v45 = vpop.permute.xlu0 %1178  ;;  %2285 = vrot.lane.b32.xlu1 %v2210_v2, %s3063_s28 }
 0x1f9   : > { %2283 = vrot.lane.b32.xlu0 %v2209_v13, %s3063_s28  ;;  %v2134_v9 = vpop.permute.xlu1 %2133  ;;  %v976_v13 = vrot.slane %v3571_v17, 7 }
 0x1fb   : > { %v2132_v39 = vpop.permute.xlu0 %2131  ;;  %1328 = vrot.lane.b32.xlu1 %v1254_v48, %s3063_s28  ;;  %v1041_v48 = vsel %vm954_vm3, 0.0, %v973_v41  ;;  %v978_v24 = vsel %vm954_vm3, %v976_v13, %v977_v37  ;;  %v2214_v41 = vsel %vm566_vm0, %v1934_v53, %v2134_v9 }
 0x1fc   : > { %v1259_v26 = vsel %vm566_vm0, %v978_v24, %v1179_v45  ;;  %v1936_v45 = vrot.slane %v3578_v22, 7 }
 0x1fd   : > { %1334 = vrot.lane.b32.xlu0 %v1257_v1, %s3063_s28  ;;  %v1177_v2 = vpop.permute.xlu1 %1176  ;;  %v1256_v1 = vsel %vm566_vm0, %v1041_v48, %v1173_v30  ;;  %v1998_v30 = vsel %vm954_vm3, 0.0, %v1932_v19 }
 0x1fe   : > { %v2213_v37 = vsel %vm566_vm0, %v1998_v30, %v2132_v39  ;;  %v1937_v39 = vsel %vm954_vm3, %v1935_v59, %v1936_v45  ;;  %v983_v30 = vrot.slane %v3601_v49, 7  ;;  %v1938_v45 = vrot.slane %v3608_v57, 7 }
 0x1ff   : > { %v1183_v46 = vpop.permute.xlu0 %1182  ;;  %2289 = vrot.lane.b32.xlu1 %v2212_v55, %s3063_s28 }
 0x201   : > { %2287 = vrot.lane.b32.xlu0 %v2211_v3, %s3063_s28  ;;  %v2138_v50 = vpop.permute.xlu1 %2137  ;;  %v979_v3 = vrot.slane %v3591_v28, 7 }
 0x203   : > { %v2136_v15 = vpop.permute.xlu0 %2135  ;;  %1332 = vrot.lane.b32.xlu1 %v1256_v1, %s3063_s28  ;;  %v1042_v1 = vsel %vm954_vm3, 0.0, %v976_v13  ;;  %v981_v9 = vsel %vm954_vm3, %v979_v3, %v980_v21  ;;  %v2216_v13 = vsel %vm566_vm0, %v1937_v39, %v2138_v50 }
 0x204   : > { %v1261_v19 = vsel %vm566_vm0, %v981_v9, %v1183_v46  ;;  %v1939_v46 = vrot.slane %v3598_v44, 7 }
 0x205   : > { %1338 = vrot.lane.b32.xlu0 %v1259_v26, %s3063_s28  ;;  %v1181_v55 = vpop.permute.xlu1 %1180  ;;  %v1258_v26 = vsel %vm566_vm0, %v1042_v1, %v1177_v2  ;;  %v1999_v2 = vsel %vm954_vm3, 0.0, %v1935_v59 }
 0x206   : > { %v2215_v21 = vsel %vm566_vm0, %v1999_v2, %v2136_v15  ;;  %v1940_v15 = vsel %vm954_vm3, %v1938_v45, %v1939_v46  ;;  %v986_v2 = vrot.slane %v3621_v11, 7  ;;  %v1941_v46 = vrot.slane %v3628_v20, 7 }
 0x207   : > { %v1187_v48 = vpop.permute.xlu0 %1186  ;;  %2293 = vrot.lane.b32.xlu1 %v2214_v41, %s3063_s28 }
 0x209   : > { %2291 = vrot.lane.b32.xlu0 %v2213_v37, %s3063_s28  ;;  %v2142_v24 = vpop.permute.xlu1 %2141  ;;  %v982_v37 = vrot.slane %v3611_v61, 7 }
 0x20b   : > { %v2140_v53 = vpop.permute.xlu0 %2139  ;;  %1336 = vrot.lane.b32.xlu1 %v1258_v26, %s3063_s28  ;;  %v1043_v26 = vsel %vm954_vm3, 0.0, %v979_v3  ;;  %v984_v50 = vsel %vm954_vm3, %v982_v37, %v983_v30  ;;  %v2218_v3 = vsel %vm566_vm0, %v1940_v15, %v2142_v24 }
 0x20c   : > { %v1263_v59 = vsel %vm566_vm0, %v984_v50, %v1187_v48  ;;  %v1942_v48 = vrot.slane %v3618_v7, 7 }
 0x20d   : > { %1342 = vrot.lane.b32.xlu0 %v1261_v19, %s3063_s28  ;;  %v1185_v41 = vpop.permute.xlu1 %1184  ;;  %v1260_v19 = vsel %vm566_vm0, %v1043_v26, %v1181_v55  ;;  %v2000_v55 = vsel %vm954_vm3, 0.0, %v1938_v45 }
 0x20e   : > { %v2217_v30 = vsel %vm566_vm0, %v2000_v55, %v2140_v53  ;;  %v1943_v53 = vsel %vm954_vm3, %v1941_v46, %v1942_v48  ;;  %v989_v55 = vrot.slane %v3641_v42, 7 }
 0x20f   : > { %v1191_v1 = vpop.permute.xlu0 %1190  ;;  %2297 = vrot.lane.b32.xlu1 %v2216_v13, %s3063_s28 }
 0x211   : > { %2295 = vrot.lane.b32.xlu0 %v2215_v21, %s3063_s28  ;;  %v2146_v9 = vpop.permute.xlu1 %2145  ;;  %v985_v21 = vrot.slane %v3631_v35, 7 }
 0x213   : > { %v2144_v39 = vpop.permute.xlu0 %2143  ;;  %1340 = vrot.lane.b32.xlu1 %v1260_v19, %s3063_s28  ;;  %v1044_v19 = vsel %vm954_vm3, 0.0, %v982_v37  ;;  %v987_v24 = vsel %vm954_vm3, %v985_v21, %v986_v2  ;;  %v2220_v37 = vsel %vm566_vm0, %v1943_v53, %v2146_v9 }
 0x214   : > { %v1265_v45 = vsel %vm566_vm0, %v987_v24, %v1191_v1  ;;  %v4411_v1 = vld [vmem:[#allocation5_spill] sm:$0xff]  ;;  %v4412_v24 = vld [vmem:[#allocation7_spill] sm:$0xff] }
 0x215   : > { %1346 = vrot.lane.b32.xlu0 %v1263_v59, %s3063_s28  ;;  %v1189_v13 = vpop.permute.xlu1 %1188  ;;  %v1262_v59 = vsel %vm566_vm0, %v1044_v19, %v1185_v41  ;;  %v2001_v41 = vsel %vm954_vm3, 0.0, %v1941_v46  ;;  %v1944_v48 = vrot.slane %v4412_v24, 7 }
 0x216   : > { %v2219_v2 = vsel %vm566_vm0, %v2001_v41, %v2144_v39  ;;  %v4413_v41 = vld [vmem:[#allocation10_spill] sm:$0xff] }
 0x217   : > { %v1195_v26 = vpop.permute.xlu0 %1194  ;;  %2301 = vrot.lane.b32.xlu1 %v2218_v3, %s3063_s28 }
 0x219   : > { %2299 = vrot.lane.b32.xlu0 %v2217_v30, %s3063_s28  ;;  %v2150_v50 = vpop.permute.xlu1 %2149  ;;  %v4410_v30 = vld [vmem:[#allocation8_spill] sm:$0xff] }
 0x21a   : > { %v988_v7 = vrot.slane %v4410_v30, 7 }
 0x21b   : > { %v2148_v15 = vpop.permute.xlu0 %2147  ;;  %1344 = vrot.lane.b32.xlu1 %v1262_v59, %s3063_s28  ;;  %v1945_v59 = vrot.slane %v4411_v1, 7  ;;  %v4414_v1 = vld [vmem:[#allocation12_spill] sm:$0xff] }
 0x21c   : > { %v990_v9 = vsel %vm954_vm3, %v988_v7, %v989_v55  ;;  %v991_v24 = vrot.slane %v4414_v1, 7 }
 0x21d   : > { %1350 = vrot.lane.b32.xlu0 %v1265_v45, %s3063_s28  ;;  %v1193_v3 = vpop.permute.xlu1 %1192  ;;  %v1045_v45 = vsel %vm954_vm3, 0.0, %v985_v21  ;;  %v1267_v46 = vsel %vm566_vm0, %v990_v9, %v1195_v26  ;;  %v1946_v39 = vsel %vm954_vm3, %v1944_v48, %v1945_v59  ;;  %v4415_v26 = vld [vmem:[#allocation9_spill] sm:$0xff]  ;;  %v4416_v9 = vld [vmem:[#allocation11_spill] sm:$0xff] }
 0x21e   : > { %v1264_v30 = vsel %vm566_vm0, %v1045_v45, %v1189_v13  ;;  %v2222_v21 = vsel %vm566_vm0, %v1946_v39, %v2150_v50  ;;  %v2002_v13 = vsel %vm954_vm3, 0.0, %v1944_v48  ;;  %v1947_v59 = vrot.slane %v4416_v9, 7 }
 0x21f   : > { %v1199_v19 = vpop.permute.xlu0 %1198  ;;  %2305 = vrot.lane.b32.xlu1 %v2220_v37, %s3063_s28  ;;  %v2221_v55 = vsel %vm566_vm0, %v2002_v13, %v2148_v15  ;;  %v4417_v13 = vld [vmem:[#allocation14_spill] sm:$0xff] }
 0x221   : > { %2303 = vrot.lane.b32.xlu0 %v2219_v2, %s3063_s28  ;;  %v2154_v42 = vpop.permute.xlu1 %2153  ;;  %v992_v2 = vrot.slane %v4413_v41, 7 }
 0x223   : > { %v2152_v53 = vpop.permute.xlu0 %2151  ;;  %1348 = vrot.lane.b32.xlu1 %v1264_v30, %s3063_s28  ;;  %v1948_v30 = vrot.slane %v4415_v26, 7  ;;  %v993_v50 = vsel %vm954_vm3, %v991_v24, %v992_v2  ;;  %v4418_v26 = vld [vmem:[#allocation16_spill] sm:$0xff] }
 0x224   : > { %v1269_v48 = vsel %vm566_vm0, %v993_v50, %v1199_v19  ;;  %v994_v9 = vrot.slane %v4418_v26, 7  ;;  %v4419_v19 = vld [vmem:[#allocation13_spill] sm:$0xff]  ;;  %v4420_v50 = vld [vmem:[#allocation15_spill] sm:$0xff] }
 0x225   : > { %1354 = vrot.lane.b32.xlu0 %v1267_v46, %s3063_s28  ;;  %v1197_v37 = vpop.permute.xlu1 %1196  ;;  %v1046_v46 = vsel %vm954_vm3, 0.0, %v988_v7  ;;  %v1949_v15 = vsel %vm954_vm3, %v1947_v59, %v1948_v30  ;;  %v1950_v30 = vrot.slane %v4420_v50, 7 }
 0x226   : > { %v1266_v1 = vsel %vm566_vm0, %v1046_v46, %v1193_v3  ;;  %v2224_v7 = vsel %vm566_vm0, %v1949_v15, %v2154_v42  ;;  %v2003_v3 = vsel %vm954_vm3, 0.0, %v1947_v59 }
 0x227   : > { %v1203_v45 = vpop.permute.xlu0 %1202  ;;  %2309 = vrot.lane.b32.xlu1 %v2222_v21, %s3063_s28  ;;  %v2223_v2 = vsel %vm566_vm0, %v2003_v3, %v2152_v53  ;;  %v4421_v3 = vld [vmem:[#allocation18_spill] sm:$0xff] }
 0x229   : > { %2307 = vrot.lane.b32.xlu0 %v2221_v55, %s3063_s28  ;;  %v2158_v41 = vpop.permute.xlu1 %2157  ;;  %v995_v55 = vrot.slane %v4417_v13, 7 }
 0x22b   : > { %v2156_v39 = vpop.permute.xlu0 %2155  ;;  %1352 = vrot.lane.b32.xlu1 %v1266_v1, %s3063_s28  ;;  %v1951_v1 = vrot.slane %v4419_v19, 7  ;;  %v996_v42 = vsel %vm954_vm3, %v994_v9, %v995_v55  ;;  %v4422_v19 = vld [vmem:[#allocation20_spill] sm:$0xff] }
 0x22c   : > { %v1271_v59 = vsel %vm566_vm0, %v996_v42, %v1203_v45  ;;  %v997_v50 = vrot.slane %v4422_v19, 7  ;;  %v4423_v45 = vld [vmem:[#allocation17_spill] sm:$0xff]  ;;  %v4424_v42 = vld [vmem:[#allocation19_spill] sm:$0xff] }
 0x22d   : > { %1358 = vrot.lane.b32.xlu0 %v1269_v48, %s3063_s28  ;;  %v1201_v21 = vpop.permute.xlu1 %1200  ;;  %v1047_v48 = vsel %vm954_vm3, 0.0, %v991_v24  ;;  %v1952_v53 = vsel %vm954_vm3, %v1950_v30, %v1951_v1  ;;  %v1953_v1 = vrot.slane %v4424_v42, 7 }
 0x22e   : > { %v1268_v26 = vsel %vm566_vm0, %v1047_v48, %v1197_v37  ;;  %v2226_v24 = vsel %vm566_vm0, %v1952_v53, %v2158_v41  ;;  %v2004_v37 = vsel %vm954_vm3, 0.0, %v1950_v30 }
 0x22f   : > { %v1207_v46 = vpop.permute.xlu0 %1206  ;;  %2313 = vrot.lane.b32.xlu1 %v2224_v7, %s3063_s28  ;;  %v2225_v55 = vsel %vm566_vm0, %v2004_v37, %v2156_v39  ;;  %v4425_v37 = vld [vmem:[#allocation23_spill] sm:$0xff] }
 0x231   : > { %2311 = vrot.lane.b32.xlu0 %v2223_v2, %s3063_s28  ;;  %v2162_v13 = vpop.permute.xlu1 %2161  ;;  %v998_v2 = vrot.slane %v4421_v3, 7 }
 0x233   : > { %v2160_v15 = vpop.permute.xlu0 %2159  ;;  %1356 = vrot.lane.b32.xlu1 %v1268_v26, %s3063_s28  ;;  %v1954_v26 = vrot.slane %v4423_v45, 7  ;;  %v999_v41 = vsel %vm954_vm3, %v997_v50, %v998_v2  ;;  %v4426_v45 = vld [vmem:[#allocation25_spill] sm:$0xff] }
 0x234   : > { %v1273_v30 = vsel %vm566_vm0, %v999_v41, %v1207_v46  ;;  %v1000_v42 = vrot.slane %v4426_v45, 7  ;;  %v4427_v46 = vld [vmem:[#allocation22_spill] sm:$0xff]  ;;  %v4428_v41 = vld [vmem:[#allocation24_spill] sm:$0xff] }
 0x235   : > { %1362 = vrot.lane.b32.xlu0 %v1271_v59, %s3063_s28  ;;  %v1205_v7 = vpop.permute.xlu1 %1204  ;;  %v1048_v59 = vsel %vm954_vm3, 0.0, %v994_v9  ;;  %v1955_v39 = vsel %vm954_vm3, %v1953_v1, %v1954_v26  ;;  %v1956_v26 = vrot.slane %v4428_v41, 7 }
 0x236   : > { %v1270_v19 = vsel %vm566_vm0, %v1048_v59, %v1201_v21  ;;  %v2228_v9 = vsel %vm566_vm0, %v1955_v39, %v2162_v13  ;;  %v2005_v21 = vsel %vm954_vm3, 0.0, %v1953_v1 }
 0x237   : > { %v1211_v48 = vpop.permute.xlu0 %1210  ;;  %2317 = vrot.lane.b32.xlu1 %v2226_v24, %s3063_s28  ;;  %v2227_v2 = vsel %vm566_vm0, %v2005_v21, %v2160_v15  ;;  %v2006_v21 = vsel %vm954_vm3, 0.0, %v1956_v26 }
 0x239   : > { %2315 = vrot.lane.b32.xlu0 %v2225_v55, %s3063_s28  ;;  %v2166_v3 = vpop.permute.xlu1 %2165  ;;  %v1001_v55 = vrot.slane %v4425_v37, 7 }
 0x23b   : > { %v2164_v53 = vpop.permute.xlu0 %2163  ;;  %1360 = vrot.lane.b32.xlu1 %v1270_v19, %s3063_s28  ;;  %v1957_v19 = vrot.slane %v4427_v46, 7  ;;  %v1002_v13 = vsel %vm954_vm3, %v1000_v42, %v1001_v55 }
 0x23c   : > { %v1275_v1 = vsel %vm566_vm0, %v1002_v13, %v1211_v48  ;;  %v1050_v48 = vsel %vm954_vm3, 0.0, %v1000_v42  ;;  %v4431_v13 = vld [vmem:[#allocation21_spill] sm:$0xff] }
 0x23d   : > { %1366 = vrot.lane.b32.xlu0 %v1273_v30, %s3063_s28  ;;  %v1209_v24 = vpop.permute.xlu1 %1208  ;;  %v1049_v30 = vsel %vm954_vm3, 0.0, %v997_v50  ;;  %v1958_v15 = vsel %vm954_vm3, %v1956_v26, %v1957_v19  ;;  %v4429_v50 = vld [vmem:[#allocation2_spill] sm:$0xff] }
 0x23e   : > { %v1272_v45 = vsel %vm566_vm0, %v1049_v30, %v1205_v7  ;;  %v2229_v7 = vsel %vm566_vm0, %v2006_v21, %v2164_v53  ;;  %v1274_v19 = vsel %vm566_vm0, %v1050_v48, %v1209_v24  ;;  %v4430_v30 = vld [vmem:[#allocation3_spill] sm:$0xff] }
 0x23f   : > { %v1311_v59 = vpop.permute.xlu0 %1310  ;;  %2321 = vrot.lane.b32.xlu1 %v2228_v9, %s3063_s28 }
 0x241   : > { %2319 = vrot.lane.b32.xlu0 %v2227_v2, %s3063_s28  ;;  %v2266_v37 = vpop.permute.xlu1 %2265  ;;  %v2230_v2 = vsel %vm566_vm0, %v1958_v15, %v2166_v3 }
 0x242   : > { %v2360_v15 = vadd.f32 %v3431_v33, %v2266_v37 }
 0x243   : > { %v2264_v39 = vpop.permute.xlu0 %2263  ;;  %1364 = vrot.lane.b32.xlu1 %v1272_v45, %s3063_s28  ;;  %v1405_v45 = vadd.f32 %v3424_v43, %v1311_v59 }
 0x244   : > { %v2359_v26 = vadd.f32 %v2264_v39, %v4430_v30 }
 0x245   : > { %1370 = vrot.lane.b32.xlu0 %v1275_v1, %s3063_s28  ;;  %v1309_v9 = vpop.permute.xlu1 %1308  ;;  %v1445_v53 = vadd.f32 %v4431_v13, %v1405_v45 }
 0x246   : > { %v1404_v46 = vadd.f32 %v1309_v9, %v4429_v50  ;;  %v2391_v43 = vadd.f32 %v2359_v26, %v4431_v13 }
 0x247   : > { %v1315_v41 = vpop.permute.xlu0 %1314  ;;  %2325 = vrot.lane.b32.xlu1 %v2230_v2, %s3063_s28 }
 0x248   : > { %v1444_v3 = vadd.f32 %v4431_v13, %v1404_v46  ;;  %v2392_v46 = vadd.f32 %v2360_v15, %v4431_v13  ;;  %v1407_v39 = vadd.f32 %v3434_v47, %v1315_v41 }
 0x249   : > { %2323 = vrot.lane.b32.xlu0 %v2229_v7, %s3063_s28  ;;  %v2270_v55 = vpop.permute.xlu1 %2269 }
 0x24a   : > { %v2362_v37 = vadd.f32 %v3441_v52, %v2270_v55 }
 0x24b   : > { %v2268_v1 = vpop.permute.xlu0 %2267  ;;  %1368 = vrot.lane.b32.xlu1 %v1274_v19, %s3063_s28 }
 0x24c   : > { %v2361_v21 = vadd.f32 %v2268_v1, %v3448_v56  ;;  %v2394_v56 = vadd.f32 %v2362_v37, %v4431_v13 }
 0x24d   : > { %1508 = vrot.lane.b32.xlu0 %v1444_v3, %s3066_s7  ;;  %v1313_v42 = vpop.permute.xlu1 %1312 }
 0x24e   : > { %v1406_v59 = vadd.f32 %v1313_v42, %v3451_v58  ;;  %v1447_v58 = vadd.f32 %v4431_v13, %v1407_v39  ;;  %v2393_v7 = vadd.f32 %v2361_v21, %v4431_v13 }
 0x24f   : > { %v1319_v24 = vpop.permute.xlu0 %1318  ;;  %1510 = vrot.lane.b32.xlu1 %v1445_v53, %s3066_s7 }
 0x250   : > { %v1446_v2 = vadd.f32 %v4431_v13, %v1406_v59  ;;  %v1409_v41 = vadd.f32 %v3461_v0, %v1319_v24 }
 0x251   : > { %2455 = vrot.lane.b32.xlu0 %v2391_v43, %s3066_s7  ;;  %v2274_v9 = vpop.permute.xlu1 %2273 }
 0x252   : > { %v2364_v55 = vadd.f32 %v3458_v62, %v2274_v9 }
 0x253   : > { %v2272_v33 = vpop.permute.xlu0 %2271  ;;  %2457 = vrot.lane.b32.xlu1 %v2392_v46, %s3066_s7 }
 0x254   : > { %v2363_v19 = vadd.f32 %v2272_v33, %v3468_v4  ;;  %v2396_v4 = vadd.f32 %v2364_v55, %v4431_v13 }
 0x255   : > { %1512 = vrot.lane.b32.xlu0 %v1446_v2, %s3066_s7  ;;  %v1317_v50 = vpop.permute.xlu1 %1316 }
 0x256   : > { %v1408_v48 = vadd.f32 %v1317_v50, %v3471_v6  ;;  %v1449_v6 = vadd.f32 %v4431_v13, %v1409_v41  ;;  %v2395_v3 = vadd.f32 %v2363_v19, %v4431_v13 }
 0x257   : > { %v1323_v47 = vpop.permute.xlu0 %1322  ;;  %1514 = vrot.lane.b32.xlu1 %v1447_v58, %s3066_s7 }
 0x258   : > { %v1448_v30 = vadd.f32 %v4431_v13, %v1408_v48  ;;  %v1411_v53 = vadd.f32 %v3481_v12, %v1323_v47 }
 0x259   : > { %2459 = vrot.lane.b32.xlu0 %v2393_v7, %s3066_s7  ;;  %v2278_v45 = vpop.permute.xlu1 %2277 }
 0x25a   : > { %v2366_v59 = vadd.f32 %v3478_v10, %v2278_v45 }
 0x25b   : > { %v2276_v52 = vpop.permute.xlu0 %2275  ;;  %2461 = vrot.lane.b32.xlu1 %v2394_v56, %s3066_s7 }
 0x25c   : > { %v2365_v42 = vadd.f32 %v2276_v52, %v3488_v16  ;;  %v2398_v16 = vadd.f32 %v2366_v59, %v4431_v13 }
 0x25d   : > { %1516 = vrot.lane.b32.xlu0 %v1448_v30, %s3066_s7  ;;  %v1321_v26 = vpop.permute.xlu1 %1320 }
 0x25e   : > { %v1410_v1 = vadd.f32 %v1321_v26, %v3491_v18  ;;  %v1451_v18 = vadd.f32 %v4431_v13, %v1411_v53  ;;  %v2397_v46 = vadd.f32 %v2365_v42, %v4431_v13 }
 0x25f   : > { %v1327_v0 = vpop.permute.xlu0 %1326  ;;  %1518 = vrot.lane.b32.xlu1 %v1449_v6, %s3066_s7 }
 0x260   : > { %v1450_v43 = vadd.f32 %v4431_v13, %v1410_v1  ;;  %v1413_v9 = vadd.f32 %v3501_v23, %v1327_v0 }
 0x261   : > { %2463 = vrot.lane.b32.xlu0 %v2395_v3, %s3066_s7  ;;  %v2282_v15 = vpop.permute.xlu1 %2281 }
 0x262   : > { %v2368_v58 = vadd.f32 %v3498_v34, %v2282_v15 }
 0x263   : > { %v2280_v62 = vpop.permute.xlu0 %2279  ;;  %2465 = vrot.lane.b32.xlu1 %v2396_v4, %s3066_s7 }
 0x264   : > { %v2367_v2 = vadd.f32 %v2280_v62, %v3508_v25  ;;  %v2400_v25 = vadd.f32 %v2368_v58, %v4431_v13 }
 0x265   : > { %1520 = vrot.lane.b32.xlu0 %v1450_v43, %s3066_s7  ;;  %v1325_v24 = vpop.permute.xlu1 %1324 }
 0x266   : > { %v1412_v39 = vadd.f32 %v1325_v24, %v3511_v38  ;;  %v1453_v38 = vadd.f32 %v4431_v13, %v1413_v9  ;;  %v2399_v50 = vadd.f32 %v2367_v2, %v4431_v13 }
 0x267   : > { %v1331_v12 = vpop.permute.xlu0 %1330  ;;  %1522 = vrot.lane.b32.xlu1 %v1451_v18, %s3066_s7 }
 0x268   : > { %v1452_v33 = vadd.f32 %v4431_v13, %v1412_v39  ;;  %v1415_v48 = vadd.f32 %v3521_v29, %v1331_v12 }
 0x269   : > { %2467 = vrot.lane.b32.xlu0 %v2397_v46, %s3066_s7  ;;  %v2286_v21 = vpop.permute.xlu1 %2285 }
 0x26a   : > { %v2370_v45 = vadd.f32 %v3518_v40, %v2286_v21 }
 0x26b   : > { %v2284_v10 = vpop.permute.xlu0 %2283  ;;  %2469 = vrot.lane.b32.xlu1 %v2398_v16, %s3066_s7 }
 0x26c   : > { %v2369_v56 = vadd.f32 %v2284_v10, %v3528_v31  ;;  %v2402_v31 = vadd.f32 %v2370_v45, %v4431_v13 }
 0x26d   : > { %1524 = vrot.lane.b32.xlu0 %v1452_v33, %s3066_s7  ;;  %v1329_v37 = vpop.permute.xlu1 %1328 }
 0x26e   : > { %v1414_v7 = vadd.f32 %v1329_v37, %v3531_v32  ;;  %v1455_v32 = vadd.f32 %v4431_v13, %v1415_v48  ;;  %v2401_v30 = vadd.f32 %v2369_v56, %v4431_v13 }
 0x26f   : > { %v1335_v23 = vpop.permute.xlu0 %1334  ;;  %1526 = vrot.lane.b32.xlu1 %v1453_v38, %s3066_s7 }
 0x270   : > { %v1454_v41 = vadd.f32 %v4431_v13, %v1414_v7  ;;  %v1417_v6 = vadd.f32 %v3541_v54, %v1335_v23 }
 0x271   : > { %2471 = vrot.lane.b32.xlu0 %v2399_v50, %s3066_s7  ;;  %v2290_v47 = vpop.permute.xlu1 %2289 }
 0x272   : > { %v2372_v1 = vadd.f32 %v3538_v51, %v2290_v47 }
 0x273   : > { %v2288_v34 = vpop.permute.xlu0 %2287  ;;  %2473 = vrot.lane.b32.xlu1 %v2400_v25, %s3066_s7 }
 0x274   : > { %v2371_v26 = vadd.f32 %v2288_v34, %v3548_v60  ;;  %v2404_v60 = vadd.f32 %v2372_v1, %v4431_v13 }
 0x275   : > { %1528 = vrot.lane.b32.xlu0 %v1454_v41, %s3066_s7  ;;  %v1333_v19 = vpop.permute.xlu1 %1332 }
 0x276   : > { %v1416_v52 = vadd.f32 %v1333_v19, %v3551_v63  ;;  %v1457_v63 = vadd.f32 %v4431_v13, %v1417_v6  ;;  %v2403_v4 = vadd.f32 %v2371_v26, %v4431_v13  ;;  %v4435_v26 = vld [vmem:[#allocation7_spill] sm:$0xff] }
 0x277   : > { %v1339_v29 = vpop.permute.xlu0 %1338  ;;  %1530 = vrot.lane.b32.xlu1 %v1455_v32, %s3066_s7  ;;  %v4432_v32 = vld [vmem:[#allocation4_spill] sm:$0xff] }
 0x278   : > { %v1456_v3 = vadd.f32 %v4431_v13, %v1416_v52  ;;  %v1419_v15 = vadd.f32 %v3561_v8, %v1339_v29  ;;  %v4433_v52 = vld [vmem:[#allocation8_spill] sm:$0xff] }
 0x279   : > { %2475 = vrot.lane.b32.xlu0 %v2401_v30, %s3066_s7  ;;  %v2294_v55 = vpop.permute.xlu1 %2293 }
 0x27a   : > { %v2374_v18 = vadd.f32 %v3558_v5, %v2294_v55 }
 0x27b   : > { %v2292_v40 = vpop.permute.xlu0 %2291  ;;  %2477 = vrot.lane.b32.xlu1 %v2402_v31, %s3066_s7  ;;  %v4434_v31 = vld [vmem:[#allocation6_spill] sm:$0xff] }
 0x27c   : > { %v2373_v43 = vadd.f32 %v2292_v40, %v3568_v14  ;;  %v2406_v14 = vadd.f32 %v2374_v18, %v4431_v13  ;;  %v4439_v18 = vld [vmem:[#allocation11_spill] sm:$0xff] }
 0x27d   : > { %1532 = vrot.lane.b32.xlu0 %v1456_v3, %s3066_s7  ;;  %v1337_v0 = vpop.permute.xlu1 %1336 }
 0x27e   : > { %v1418_v53 = vadd.f32 %v1337_v0, %v3571_v17  ;;  %v1459_v17 = vadd.f32 %v4431_v13, %v1419_v15  ;;  %v2405_v24 = vadd.f32 %v2373_v43, %v4431_v13  ;;  %v4436_v0 = vld [vmem:[#allocation5_spill] sm:$0xff] }
 0x27f   : > { %v1343_v54 = vpop.permute.xlu0 %1342  ;;  %1534 = vrot.lane.b32.xlu1 %v1457_v63, %s3066_s7 }
 0x280   : > { %v1458_v62 = vadd.f32 %v4431_v13, %v1418_v53  ;;  %v1421_v39 = vadd.f32 %v3581_v36, %v1343_v54 }
 0x281   : > { %2479 = vrot.lane.b32.xlu0 %v2403_v4, %s3066_s7  ;;  %v2298_v42 = vpop.permute.xlu1 %2297 }
 0x282   : > { %v2376_v21 = vadd.f32 %v3578_v22, %v2298_v42 }
 0x283   : > { %v2296_v51 = vpop.permute.xlu0 %2295  ;;  %2481 = vrot.lane.b32.xlu1 %v2404_v60, %s3066_s7  ;;  %v4437_v60 = vld [vmem:[#allocation12_spill] sm:$0xff] }
 0x284   : > { %v2375_v16 = vadd.f32 %v2296_v51, %v3588_v27  ;;  %v2408_v27 = vadd.f32 %v2376_v21, %v4431_v13 }
 0x285   : > { %1536 = vrot.lane.b32.xlu0 %v1458_v62, %s3066_s7  ;;  %v1341_v59 = vpop.permute.xlu1 %1340  ;;  %v4438_v62 = vld [vmem:[#allocation10_spill] sm:$0xff] }
 0x286   : > { %v1420_v46 = vadd.f32 %v1341_v59, %v3591_v28  ;;  %v1461_v28 = vadd.f32 %v4431_v13, %v1421_v39  ;;  %v2407_v33 = vadd.f32 %v2375_v16, %v4431_v13 }
 0x287   : > { %v1347_v8 = vpop.permute.xlu0 %1346  ;;  %1538 = vrot.lane.b32.xlu1 %v1459_v17, %s3066_s7 }
 0x288   : > { %v1460_v9 = vadd.f32 %v4431_v13, %v1420_v46  ;;  %v1423_v38 = vadd.f32 %v3601_v49, %v1347_v8 }
 0x289   : > { %2483 = vrot.lane.b32.xlu0 %v2405_v24, %s3066_s7  ;;  %v2302_v12 = vpop.permute.xlu1 %2301 }
 0x28a   : > { %v2378_v7 = vadd.f32 %v3598_v44, %v2302_v12 }
 0x28b   : > { %v2300_v5 = vpop.permute.xlu0 %2299  ;;  %2485 = vrot.lane.b32.xlu1 %v2406_v14, %s3066_s7  ;;  %v4440_v14 = vld [vmem:[#allocation9_spill] sm:$0xff] }
 0x28c   : > { %v2377_v37 = vadd.f32 %v2300_v5, %v3608_v57  ;;  %v2410_v57 = vadd.f32 %v2378_v7, %v4431_v13 }
 0x28d   : > { %1540 = vrot.lane.b32.xlu0 %v1460_v9, %s3066_s7  ;;  %v1345_v2 = vpop.permute.xlu1 %1344  ;;  %v4441_v9 = vld [vmem:[#allocation16_spill] sm:$0xff] }
 0x28e   : > { %v1422_v10 = vadd.f32 %v1345_v2, %v3611_v61  ;;  %v1463_v61 = vadd.f32 %v4431_v13, %v1423_v38  ;;  %v2409_v25 = vadd.f32 %v2377_v37, %v4431_v13  ;;  %v4442_v2 = vld [vmem:[#allocation14_spill] sm:$0xff] }
 0x28f   : > { %v1351_v36 = vpop.permute.xlu0 %1350  ;;  %1542 = vrot.lane.b32.xlu1 %v1461_v28, %s3066_s7 }
 0x290   : > { %v1462_v50 = vadd.f32 %v4431_v13, %v1422_v10  ;;  %v1425_v47 = vadd.f32 %v3621_v11, %v1351_v36  ;;  %v4443_v36 = vld [vmem:[#allocation15_spill] sm:$0xff] }
 0x291   : > { %2487 = vrot.lane.b32.xlu0 %v2407_v33, %s3066_s7  ;;  %v2306_v58 = vpop.permute.xlu1 %2305 }
 0x292   : > { %v2380_v45 = vadd.f32 %v4432_v32, %v2306_v58 }
 0x293   : > { %v2304_v22 = vpop.permute.xlu0 %2303  ;;  %2489 = vrot.lane.b32.xlu1 %v2408_v27, %s3066_s7 }
 0x294   : > { %v2379_v41 = vadd.f32 %v2304_v22, %v3628_v20  ;;  %v2412_v20 = vadd.f32 %v2380_v45, %v4431_v13  ;;  %v4448_v45 = vld [vmem:[#allocation17_spill] sm:$0xff] }
 0x295   : > { %1544 = vrot.lane.b32.xlu0 %v1462_v50, %s3066_s7  ;;  %v1349_v23 = vpop.permute.xlu1 %1348  ;;  %v4444_v50 = vld [vmem:[#allocation13_spill] sm:$0xff] }
 0x296   : > { %v1424_v48 = vadd.f32 %v1349_v23, %v3631_v35  ;;  %v1465_v35 = vadd.f32 %v4431_v13, %v1425_v47  ;;  %v2411_v30 = vadd.f32 %v2379_v41, %v4431_v13  ;;  %v4445_v23 = vld [vmem:[#allocation20_spill] sm:$0xff]  ;;  %v4447_v41 = vld [vmem:[#allocation19_spill] sm:$0xff] }
 0x297   : > { %v1355_v49 = vpop.permute.xlu0 %1354  ;;  %1546 = vrot.lane.b32.xlu1 %v1463_v61, %s3066_s7 }
 0x298   : > { %v1464_v34 = vadd.f32 %v4431_v13, %v1424_v48  ;;  %v1427_v6 = vadd.f32 %v4434_v31, %v1355_v49 }
 0x299   : > { %2491 = vrot.lane.b32.xlu0 %v2409_v25, %s3066_s7  ;;  %v2310_v56 = vpop.permute.xlu1 %2309 }
 0x29a   : > { %v1467_v1 = vadd.f32 %v4431_v13, %v1427_v6  ;;  %v2382_v4 = vadd.f32 %v4436_v0, %v2310_v56  ;;  %v4450_v6 = vld [vmem:[#allocation23_spill] sm:$0xff] }
 0x29b   : > { %v2308_v44 = vpop.permute.xlu0 %2307  ;;  %2493 = vrot.lane.b32.xlu1 %v2410_v57, %s3066_s7  ;;  %v4446_v57 = vld [vmem:[#allocation18_spill] sm:$0xff] }
 0x29c   : > { %v2381_v3 = vadd.f32 %v2308_v44, %v4435_v26  ;;  %v2414_v43 = vadd.f32 %v2382_v4, %v4431_v13  ;;  %v4452_v4 = vld [vmem:[#allocation22_spill] sm:$0xff] }
 0x29d   : > { %1548 = vrot.lane.b32.xlu0 %v1464_v34, %s3066_s7  ;;  %v1353_v19 = vpop.permute.xlu1 %1352 }
 0x29e   : > { %v1426_v29 = vadd.f32 %v1353_v19, %v4433_v52  ;;  %v2413_v54 = vadd.f32 %v2381_v3, %v4431_v13  ;;  %v4451_v3 = vld [vmem:[#allocation24_spill] sm:$0xff] }
 0x29f   : > { %v1359_v11 = vpop.permute.xlu0 %1358  ;;  %1550 = vrot.lane.b32.xlu1 %v1465_v35, %s3066_s7 }
 0x2a0   : > { %v1466_v40 = vadd.f32 %v4431_v13, %v1426_v29  ;;  %v1429_v51 = vadd.f32 %v4438_v62, %v1359_v11  ;;  %v4449_v29 = vld [vmem:[#allocation25_spill] sm:$0xff] }
 0x2a1   : > { %2495 = vrot.lane.b32.xlu0 %v2411_v30, %s3066_s7  ;;  %v2314_v55 = vpop.permute.xlu1 %2313 }
 0x2a2   : > { %v1469_v8 = vadd.f32 %v4431_v13, %v1429_v51  ;;  %v2384_v39 = vadd.f32 %v4440_v14, %v2314_v55 }
 0x2a3   : > { %v2312_v63 = vpop.permute.xlu0 %2311  ;;  %2497 = vrot.lane.b32.xlu1 %v2412_v20, %s3066_s7 }
 0x2a4   : > { %v2383_v59 = vadd.f32 %v2312_v63, %v4439_v18  ;;  %v2416_v21 = vadd.f32 %v2384_v39, %v4431_v13 }
 0x2a5   : > { %1552 = vrot.lane.b32.xlu0 %v1466_v40, %s3066_s7  ;;  %v1357_v53 = vpop.permute.xlu1 %1356 }
 0x2a6   : > { %v1428_v15 = vadd.f32 %v1357_v53, %v4437_v60  ;;  %v2415_v16 = vadd.f32 %v2383_v59, %v4431_v13 }
 0x2a7   : > { %v1363_v42 = vpop.permute.xlu0 %1362  ;;  %1554 = vrot.lane.b32.xlu1 %v1467_v1, %s3066_s7 }
 0x2a8   : > { %v1468_v24 = vadd.f32 %v4431_v13, %v1428_v15  ;;  %v1431_v33 = vadd.f32 %v4442_v2, %v1363_v42 }
 0x2a9   : > { %2499 = vrot.lane.b32.xlu0 %v2413_v54, %s3066_s7  ;;  %v2318_v17 = vpop.permute.xlu1 %2317 }
 0x2aa   : > { %v1471_v37 = vadd.f32 %v4431_v13, %v1431_v33  ;;  %v2386_v22 = vadd.f32 %v4444_v50, %v2318_v17 }
 0x2ab   : > { %v2316_v46 = vpop.permute.xlu0 %2315  ;;  %2501 = vrot.lane.b32.xlu1 %v2414_v43, %s3066_s7 }
 0x2ac   : > { %v2385_v27 = vadd.f32 %v2316_v46, %v4443_v36  ;;  %v2418_v49 = vadd.f32 %v2386_v22, %v4431_v13 }
 0x2ad   : > { %1556 = vrot.lane.b32.xlu0 %v1468_v24, %s3066_s7  ;;  %v1361_v12 = vpop.permute.xlu1 %1360 }
 0x2ae   : > { %v1430_v5 = vadd.f32 %v1361_v12, %v4441_v9  ;;  %v2417_v7 = vadd.f32 %v2385_v27, %v4431_v13 }
 0x2af   : > { %v1367_v28 = vpop.permute.xlu0 %1366  ;;  %1558 = vrot.lane.b32.xlu1 %v1469_v8, %s3066_s7 }
 0x2b0   : > { %v1470_v38 = vadd.f32 %v4431_v13, %v1430_v5  ;;  %v1433_v47 = vadd.f32 %v4446_v57, %v1367_v28 }
 0x2b1   : > { %2503 = vrot.lane.b32.xlu0 %v2415_v16, %s3066_s7  ;;  %v2322_v10 = vpop.permute.xlu1 %2321 }
 0x2b2   : > { %v1473_v32 = vadd.f32 %v4431_v13, %v1433_v47  ;;  %v2388_v19 = vadd.f32 %v4448_v45, %v2322_v10 }
 0x2b3   : > { %v2320_v58 = vpop.permute.xlu0 %2319  ;;  %2505 = vrot.lane.b32.xlu1 %v2416_v21, %s3066_s7 }
 0x2b4   : > { %v2387_v34 = vadd.f32 %v2320_v58, %v4447_v41  ;;  %v2420_v31 = vadd.f32 %v2388_v19, %v4431_v13 }
 0x2b5   : > { %1560 = vrot.lane.b32.xlu0 %v1470_v38, %s3066_s7  ;;  %v1365_v61 = vpop.permute.xlu1 %1364 }
 0x2b6   : > { %v1432_v25 = vadd.f32 %v1365_v61, %v4445_v23  ;;  %v2419_v52 = vadd.f32 %v2387_v34, %v4431_v13 }
 0x2b7   : > { %v1371_v48 = vpop.permute.xlu0 %1370  ;;  %1562 = vrot.lane.b32.xlu1 %v1471_v37, %s3066_s7 }
 0x2b8   : > { %v1472_v44 = vadd.f32 %v4431_v13, %v1432_v25  ;;  %v1435_v55 = vadd.f32 %v4450_v6, %v1371_v48 }
 0x2b9   : > { %2507 = vrot.lane.b32.xlu0 %v2417_v7, %s3066_s7  ;;  %v2326_v56 = vpop.permute.xlu1 %2325 }
 0x2ba   : > { %v1475_v0 = vadd.f32 %v4431_v13, %v1435_v55  ;;  %v2390_v53 = vadd.f32 %v4452_v4, %v2326_v56 }
 0x2bb   : > { %v2324_v35 = vpop.permute.xlu0 %2323  ;;  %2509 = vrot.lane.b32.xlu1 %v2418_v49, %s3066_s7 }
 0x2bc   : > { %v2389_v40 = vadd.f32 %v2324_v35, %v4451_v3  ;;  %v2422_v42 = vadd.f32 %v2390_v53, %v4431_v13 }
 0x2bd   : > { %1564 = vrot.lane.b32.xlu0 %v1472_v44, %s3066_s7  ;;  %v1369_v30 = vpop.permute.xlu1 %1368 }
 0x2be   : > { %v1434_v11 = vadd.f32 %v1369_v30, %v4449_v29  ;;  %v2421_v60 = vadd.f32 %v2389_v40, %v4431_v13 }
 0x2bf   : > { %v1509_v20 = vpop.permute.xlu0 %1508  ;;  %1566 = vrot.lane.b32.xlu1 %v1473_v32, %s3066_s7 }
 0x2c0   : > { %1604 = vst.msk [vmem:[%s4179_s11] sm:$0xff] %vm600_vm1, %v1509_v20  ;;  %v1474_v63 = vadd.f32 %v4431_v13, %v1434_v11 }
 0x2c1   : > { %2511 = vrot.lane.b32.xlu0 %v2419_v52, %s3066_s7  ;;  %v1511_v26 = vpop.permute.xlu1 %1510 }
 0x2c2   : > { %1605 = vst.msk [vmem:[%s4179_s11 + $0x8] sm:$0xff] %vm600_vm1, %v1511_v26 }
 0x2c3   : > { %v2456_v1 = vpop.permute.xlu0 %2455  ;;  %2513 = vrot.lane.b32.xlu1 %v2420_v31, %s3066_s7 }
 0x2c4   : > { %2801 = vst.msk [vmem:[%s4179_s11 + $0x10] sm:$0xff] %vm600_vm1, %v2456_v1 }
 0x2c5   : > { %1568 = vrot.lane.b32.xlu0 %v1474_v63, %s3066_s7  ;;  %v2458_v54 = vpop.permute.xlu1 %2457 }
 0x2c6   : > { %2802 = vst.msk [vmem:[%s4179_s11 + $0x18] sm:$0xff] %vm600_vm1, %v2458_v54 }
 0x2c7   : > { %v1513_v15 = vpop.permute.xlu0 %1512  ;;  %1570 = vrot.lane.b32.xlu1 %v1475_v0, %s3066_s7 }
 0x2c8   : > { %1606 = vst.msk [vmem:[%s4179_s11 + $0x20] sm:$0xff] %vm600_vm1, %v1513_v15 }
 0x2c9   : > { %2515 = vrot.lane.b32.xlu0 %v2421_v60, %s3066_s7  ;;  %v1515_v43 = vpop.permute.xlu1 %1514 }
 0x2ca   : > { %1607 = vst.msk [vmem:[%s4179_s11 + $0x28] sm:$0xff] %vm600_vm1, %v1515_v43 }
 0x2cb   : > { %v2460_v62 = vpop.permute.xlu0 %2459  ;;  %2517 = vrot.lane.b32.xlu1 %v2422_v42, %s3066_s7 }
 0x2cc   : > { %2803 = vst.msk [vmem:[%s4179_s11 + $0x30] sm:$0xff] %vm600_vm1, %v2460_v62 }
 0x2cd   : > { %v2462_v51 = vpop.permute.xlu1 %2461 }
 0x2ce   : > { %2804 = vst.msk [vmem:[%s4179_s11 + $0x38] sm:$0xff] %vm600_vm1, %v2462_v51 }
 0x2cf   : > { %v1517_v17 = vpop.permute.xlu0 %1516 }
 0x2d0   : > { %1608 = vst.msk [vmem:[%s4179_s11 + $0x40] sm:$0xff] %vm600_vm1, %v1517_v17 }
 0x2d1   : > { %v1519_v13 = vpop.permute.xlu1 %1518 }
 0x2d2   : > { %1609 = vst.msk [vmem:[%s4179_s11 + $0x48] sm:$0xff] %vm600_vm1, %v1519_v13 }
 0x2d3   : > { %v2464_v18 = vpop.permute.xlu0 %2463 }
 0x2d4   : > { %2805 = vst.msk [vmem:[%s4179_s11 + $0x50] sm:$0xff] %vm600_vm1, %v2464_v18 }
 0x2d5   : > { %v2466_v59 = vpop.permute.xlu1 %2465 }
 0x2d6   : > { %2806 = vst.msk [vmem:[%s4179_s11 + $0x58] sm:$0xff] %vm600_vm1, %v2466_v59 }
 0x2d7   : > { %v1521_v24 = vpop.permute.xlu0 %1520 }
 0x2d8   : > { %1610 = vst.msk [vmem:[%s4179_s11 + $0x60] sm:$0xff] %vm600_vm1, %v1521_v24 }
 0x2d9   : > { %v1523_v46 = vpop.permute.xlu1 %1522 }
 0x2da   : > { %1611 = vst.msk [vmem:[%s4179_s11 + $0x68] sm:$0xff] %vm600_vm1, %v1523_v46 }
 0x2db   : > { %v2468_v8 = vpop.permute.xlu0 %2467 }
 0x2dc   : > { %2807 = vst.msk [vmem:[%s4179_s11 + $0x70] sm:$0xff] %vm600_vm1, %v2468_v8 }
 0x2dd   : > { %v2470_v14 = vpop.permute.xlu1 %2469 }
 0x2de   : > { %2808 = vst.msk [vmem:[%s4179_s11 + $0x78] sm:$0xff] %vm600_vm1, %v2470_v14 }
 0x2df   : > { %v1525_v39 = vpop.permute.xlu0 %1524 }
 0x2e0   : > { %1612 = vst.msk [vmem:[%s4179_s11 + $0x80] sm:$0xff] %vm600_vm1, %v1525_v39 }
 0x2e1   : > { %v1527_v12 = vpop.permute.xlu1 %1526 }
 0x2e2   : > { %1613 = vst.msk [vmem:[%s4179_s11 + $0x88] sm:$0xff] %vm600_vm1, %v1527_v12 }
 0x2e3   : > { %v2472_v16 = vpop.permute.xlu0 %2471 }
 0x2e4   : > { %2809 = vst.msk [vmem:[%s4179_s11 + $0x90] sm:$0xff] %vm600_vm1, %v2472_v16 }
 0x2e5   : > { %v2474_v9 = vpop.permute.xlu1 %2473 }
 0x2e6   : > { %2810 = vst.msk [vmem:[%s4179_s11 + $0x98] sm:$0xff] %vm600_vm1, %v2474_v9 }
 0x2e7   : > { %v1529_v5 = vpop.permute.xlu0 %1528 }
 0x2e8   : > { %1614 = vst.msk [vmem:[%s4179_s11 + $0xa0] sm:$0xff] %vm600_vm1, %v1529_v5 }
 0x2e9   : > { %v1531_v28 = vpop.permute.xlu1 %1530 }
 0x2ea   : > { %1615 = vst.msk [vmem:[%s4179_s11 + $0xa8] sm:$0xff] %vm600_vm1, %v1531_v28 }
 0x2eb   : > { %v2476_v21 = vpop.permute.xlu0 %2475 }
 0x2ec   : > { %2811 = vst.msk [vmem:[%s4179_s11 + $0xb0] sm:$0xff] %vm600_vm1, %v2476_v21 }
 0x2ed   : > { %v2478_v2 = vpop.permute.xlu1 %2477 }
 0x2ee   : > { %2812 = vst.msk [vmem:[%s4179_s11 + $0xb8] sm:$0xff] %vm600_vm1, %v2478_v2 }
 0x2ef   : > { %v1533_v33 = vpop.permute.xlu0 %1532 }
 0x2f0   : > { %1616 = vst.msk [vmem:[%s4179_s11 + $0xc0] sm:$0xff] %vm600_vm1, %v1533_v33 }
 0x2f1   : > { %v1535_v10 = vpop.permute.xlu1 %1534 }
 0x2f2   : > { %1617 = vst.msk [vmem:[%s4179_s11 + $0xc8] sm:$0xff] %vm600_vm1, %v1535_v10 }
 0x2f3   : > { %v2480_v36 = vpop.permute.xlu0 %2479 }
 0x2f4   : > { %2813 = vst.msk [vmem:[%s4179_s11 + $0xd0] sm:$0xff] %vm600_vm1, %v2480_v36 }
 0x2f5   : > { %v2482_v27 = vpop.permute.xlu1 %2481 }
 0x2f6   : > { %2814 = vst.msk [vmem:[%s4179_s11 + $0xd8] sm:$0xff] %vm600_vm1, %v2482_v27 }
 0x2f7   : > { %v1537_v38 = vpop.permute.xlu0 %1536 }
 0x2f8   : > { %1618 = vst.msk [vmem:[%s4179_s11 + $0xe0] sm:$0xff] %vm600_vm1, %v1537_v38 }
 0x2f9   : > { %v1539_v58 = vpop.permute.xlu1 %1538 }
 0x2fa   : > { %1619 = vst.msk [vmem:[%s4179_s11 + $0xe8] sm:$0xff] %vm600_vm1, %v1539_v58 }
 0x2fb   : > { %v2484_v37 = vpop.permute.xlu0 %2483 }
 0x2fc   : > { %2815 = vst.msk [vmem:[%s4179_s11 + $0xf0] sm:$0xff] %vm600_vm1, %v2484_v37 }
 0x2fd   : > { %v2486_v50 = vpop.permute.xlu1 %2485 }
 0x2fe   : > { %2816 = vst.msk [vmem:[%s4179_s11 + $0xf8] sm:$0xff] %vm600_vm1, %v2486_v50 }
 0x2ff   : > { %v1541_v22 = vpop.permute.xlu0 %1540 }
 0x300   : > { %1620 = vst.msk [vmem:[%s4179_s11 + $0x100] sm:$0xff] %vm600_vm1, %v1541_v22 }
 0x301   : > { %v1543_v61 = vpop.permute.xlu1 %1542 }
 0x302   : > { %1621 = vst.msk [vmem:[%s4179_s11 + $0x108] sm:$0xff] %vm600_vm1, %v1543_v61 }
 0x303   : > { %v2488_v7 = vpop.permute.xlu0 %2487 }
 0x304   : > { %2817 = vst.msk [vmem:[%s4179_s11 + $0x110] sm:$0xff] %vm600_vm1, %v2488_v7 }
 0x305   : > { %v2490_v23 = vpop.permute.xlu1 %2489 }
 0x306   : > { %2818 = vst.msk [vmem:[%s4179_s11 + $0x118] sm:$0xff] %vm600_vm1, %v2490_v23 }
 0x307   : > { %v1545_v25 = vpop.permute.xlu0 %1544 }
 0x308   : > { %1622 = vst.msk [vmem:[%s4179_s11 + $0x120] sm:$0xff] %vm600_vm1, %v1545_v25 }
 0x309   : > { %v1547_v48 = vpop.permute.xlu1 %1546 }
 0x30a   : > { %1623 = vst.msk [vmem:[%s4179_s11 + $0x128] sm:$0xff] %vm600_vm1, %v1547_v48 }
 0x30b   : > { %v2492_v49 = vpop.permute.xlu0 %2491 }
 0x30c   : > { %2819 = vst.msk [vmem:[%s4179_s11 + $0x130] sm:$0xff] %vm600_vm1, %v2492_v49 }
 0x30d   : > { %v2494_v57 = vpop.permute.xlu1 %2493 }
 0x30e   : > { %2820 = vst.msk [vmem:[%s4179_s11 + $0x138] sm:$0xff] %vm600_vm1, %v2494_v57 }
 0x30f   : > { %v1549_v47 = vpop.permute.xlu0 %1548 }
 0x310   : > { %1624 = vst.msk [vmem:[%s4179_s11 + $0x140] sm:$0xff] %vm600_vm1, %v1549_v47 }
 0x311   : > { %v1551_v56 = vpop.permute.xlu1 %1550 }
 0x312   : > { %1625 = vst.msk [vmem:[%s4179_s11 + $0x148] sm:$0xff] %vm600_vm1, %v1551_v56 }
 0x313   : > { %v2496_v41 = vpop.permute.xlu0 %2495 }
 0x314   : > { %2821 = vst.msk [vmem:[%s4179_s11 + $0x150] sm:$0xff] %vm600_vm1, %v2496_v41 }
 0x315   : > { %v2498_v34 = vpop.permute.xlu1 %2497 }
 0x316   : > { %2822 = vst.msk [vmem:[%s4179_s11 + $0x158] sm:$0xff] %vm600_vm1, %v2498_v34 }
 0x317   : > { %v1553_v44 = vpop.permute.xlu0 %1552 }
 0x318   : > { %1626 = vst.msk [vmem:[%s4179_s11 + $0x160] sm:$0xff] %vm600_vm1, %v1553_v44 }
 0x319   : > { %v1555_v35 = vpop.permute.xlu1 %1554 }
 0x31a   : > { %1627 = vst.msk [vmem:[%s4179_s11 + $0x168] sm:$0xff] %vm600_vm1, %v1555_v35 }
 0x31b   : > { %v2500_v32 = vpop.permute.xlu0 %2499 }
 0x31c   : > { %2823 = vst.msk [vmem:[%s4179_s11 + $0x170] sm:$0xff] %vm600_vm1, %v2500_v32 }
 0x31d   : > { %v2502_v45 = vpop.permute.xlu1 %2501 }
 0x31e   : > { %2824 = vst.msk [vmem:[%s4179_s11 + $0x178] sm:$0xff] %vm600_vm1, %v2502_v45 }
 0x31f   : > { %v1557_v19 = vpop.permute.xlu0 %1556 }
 0x320   : > { %1628 = vst.msk [vmem:[%s4179_s11 + $0x180] sm:$0xff] %vm600_vm1, %v1557_v19 }
 0x321   : > { %v1559_v30 = vpop.permute.xlu1 %1558 }
 0x322   : > { %1629 = vst.msk [vmem:[%s4179_s11 + $0x188] sm:$0xff] %vm600_vm1, %v1559_v30 }
 0x323   : > { %v2504_v52 = vpop.permute.xlu0 %2503 }
 0x324   : > { %2825 = vst.msk [vmem:[%s4179_s11 + $0x190] sm:$0xff] %vm600_vm1, %v2504_v52 }
 0x325   : > { %v2506_v29 = vpop.permute.xlu1 %2505 }
 0x326   : > { %2826 = vst.msk [vmem:[%s4179_s11 + $0x198] sm:$0xff] %vm600_vm1, %v2506_v29 }
 0x327   : > { %v1561_v11 = vpop.permute.xlu0 %1560 }
 0x328   : > { %1630 = vst.msk [vmem:[%s4179_s11 + $0x1a0] sm:$0xff] %vm600_vm1, %v1561_v11 }
 0x329   : > { %v1563_v20 = vpop.permute.xlu1 %1562 }
 0x32a   : > { %1631 = vst.msk [vmem:[%s4179_s11 + $0x1a8] sm:$0xff] %vm600_vm1, %v1563_v20 }
 0x32b   : > { %v2508_v31 = vpop.permute.xlu0 %2507 }
 0x32c   : > { %2827 = vst.msk [vmem:[%s4179_s11 + $0x1b0] sm:$0xff] %vm600_vm1, %v2508_v31 }
 0x32d   : > { %v2510_v6 = vpop.permute.xlu1 %2509 }
 0x32e   : > { %2828 = vst.msk [vmem:[%s4179_s11 + $0x1b8] sm:$0xff] %vm600_vm1, %v2510_v6 }
 0x32f   : > { %v1565_v55 = vpop.permute.xlu0 %1564 }
 0x330   : > { %1632 = vst.msk [vmem:[%s4179_s11 + $0x1c0] sm:$0xff] %vm600_vm1, %v1565_v55 }
 0x331   : > { %v1567_v26 = vpop.permute.xlu1 %1566 }
 0x332   : > { %1633 = vst.msk [vmem:[%s4179_s11 + $0x1c8] sm:$0xff] %vm600_vm1, %v1567_v26 }
 0x333   : > { %v2512_v3 = vpop.permute.xlu0 %2511 }
 0x334   : > { %2829 = vst.msk [vmem:[%s4179_s11 + $0x1d0] sm:$0xff] %vm600_vm1, %v2512_v3 }
 0x335   : > { %v2514_v40 = vpop.permute.xlu1 %2513 }
 0x336   : > { %2830 = vst.msk [vmem:[%s4179_s11 + $0x1d8] sm:$0xff] %vm600_vm1, %v2514_v40 }
 0x337   : > { %v1569_v63 = vpop.permute.xlu0 %1568 }
 0x338   : > { %1634 = vst.msk [vmem:[%s4179_s11 + $0x1e0] sm:$0xff] %vm600_vm1, %v1569_v63 }
 0x339   : > { %v1571_v1 = vpop.permute.xlu1 %1570 }
 0x33a   : > { %1635 = vst.msk [vmem:[%s4179_s11 + $0x1e8] sm:$0xff] %vm600_vm1, %v1571_v1 }
 0x33b   : > { %v2516_v0 = vpop.permute.xlu0 %2515 }
 0x33c   : > { %2831 = vst.msk [vmem:[%s4179_s11 + $0x1f0] sm:$0xff] %vm600_vm1, %v2516_v0 }
 0x33d   : > { %v2518_v4 = vpop.permute.xlu1 %2517 }
 0x33e   : > { %2832 = vst.msk [vmem:[%s4179_s11 + $0x1f8] sm:$0xff] %vm600_vm1, %v2518_v4 }
 0x33f PF: > { %s15_s20 = sadd.s32 1, %s3061_s20   ;;  %s4453_s18 = smov %s3057_s19 }
 0x340   : > { %p12_p5 = scmp.ge.s32.totalorder %s15_s20, 4   ;;  %s4454_s19 = smov %s4456_s1 }
 0x342   :  { %14 = sbr.rel (!%p12_p5) target bundleno = 2 (0x2), region = 78 }

</bundles_post_ra>
